<compile_context>
chip_gen: v7x
topology: tpu7x:2x2x1
jax: 0.10.0
libtpu: 0.0.40
codegen_flags: <defaults>
</compile_context>

<pallas_src>
import functools

import jax
import jax.numpy as jnp
from jax.experimental import pallas as pl
from jax.experimental.pallas import tpu as pltpu


_VMEM_LIMIT_BYTES = 64 * 1024 * 1024  # <= physical VMEM on v5e/v6e/v7x


# --------------------------------------------------------------------------- #
# Kernels
# --------------------------------------------------------------------------- #
def _linear_kernel(x_ref, w_ref, o_ref):
    # One row-tile of X times the full (small, padded) weight matrix.
    o_ref[...] = jnp.dot(
        x_ref[...], w_ref[...], preferred_element_type=jnp.float32
    ).astype(o_ref.dtype)


def _gcn_fused_kernel(adj_ref, z_ref, b_ref, w_ref, o_ref, acc_ref, *, tk):
    """acc_i = sum_k Â[i,k] @ Z1[k] (+ b1);  o_i = relu(acc_i) @ W23.

    grid = (row_tiles i, contraction tiles k).  z_ref is the FULL resident Z1
    (constant index map -> DMA'd once), w_ref the full fused [W2||W3].
    """
    k = pl.program_id(1)

    @pl.when(k == 0)
    def _():  # fold the bias into the accumulator init
        acc_ref[...] = jnp.broadcast_to(
            b_ref[...].astype(jnp.float32), acc_ref.shape)

    kk = pl.multiple_of(k * tk, tk)
    acc_ref[...] += jnp.dot(
        adj_ref[...], z_ref[pl.ds(kk, tk), :],
        preferred_element_type=jnp.float32)

    @pl.when(k == pl.num_programs(1) - 1)
    def _():  # epilogue: relu then the fused stage-2 linear (h @ W23)
        h = jnp.maximum(acc_ref[...], 0.0).astype(jnp.bfloat16)
        o_ref[...] = jnp.dot(
            h, w_ref[...], preferred_element_type=jnp.float32
        ).astype(o_ref.dtype)


def _aggregate_kernel(adj_ref, z_ref, b_ref, o_ref, *, tk):
    """o_i = b + sum_k Â[i,k] @ Z2[k], accumulating directly into the resident
    f32 output block (no scratch).  z_ref is the full resident Z2."""
    k = pl.program_id(1)

    kk = pl.multiple_of(k * tk, tk)
    contrib = jnp.dot(
        adj_ref[...], z_ref[pl.ds(kk, tk), :],
        preferred_element_type=jnp.float32)

    @pl.when(k == 0)
    def _():
        o_ref[...] = b_ref[...].astype(jnp.float32) + contrib

    @pl.when(k > 0)
    def _():
        o_ref[...] += contrib


# --------------------------------------------------------------------------- #
# Pallas wrappers
# --------------------------------------------------------------------------- #
def _linear(x, w, *, tm, out_dtype):
    n, cin = x.shape
    cout = w.shape[1]
    return pl.pallas_call(
        _linear_kernel,
        out_shape=jax.ShapeDtypeStruct((n, cout), out_dtype),
        grid=(n // tm,),
        in_specs=[
            pl.BlockSpec((tm, cin), lambda i: (i, 0)),
            pl.BlockSpec((cin, cout), lambda i: (0, 0)),
        ],
        out_specs=pl.BlockSpec((tm, cout), lambda i: (i, 0)),
        compiler_params=pltpu.CompilerParams(
            dimension_semantics=("parallel",),
            vmem_limit_bytes=_VMEM_LIMIT_BYTES),
    )(x, w)


def _gcn_fused(adj, z, b, w, *, tm, tk, out_dtype):
    n = adj.shape[0]
    hid = z.shape[1]
    cout = w.shape[1]
    flops = 2 * n * n * hid + 2 * n * hid * cout
    bytes_accessed = (
        n * n * adj.dtype.itemsize          # Â streamed once
        + n * hid * z.dtype.itemsize        # resident Z1, read once
        + hid * cout * w.dtype.itemsize
        + n * cout * jnp.dtype(out_dtype).itemsize)
    return pl.pallas_call(
        functools.partial(_gcn_fused_kernel, tk=tk),
        out_shape=jax.ShapeDtypeStruct((n, cout), out_dtype),
        grid=(n // tm, n // tk),
        in_specs=[
            pl.BlockSpec((tm, tk), lambda i, k: (i, k)),   # Â tile
            pl.BlockSpec((n, hid), lambda i, k: (0, 0)),   # Z1 (resident)
            pl.BlockSpec((1, hid), lambda i, k: (0, 0)),   # b1
            pl.BlockSpec((hid, cout), lambda i, k: (0, 0)),  # W23 (resident)
        ],
        out_specs=pl.BlockSpec((tm, cout), lambda i, k: (i, 0)),
        scratch_shapes=[pltpu.VMEM((tm, hid), jnp.float32)],
        compiler_params=pltpu.CompilerParams(
            dimension_semantics=("parallel", "arbitrary"),
            vmem_limit_bytes=_VMEM_LIMIT_BYTES),
        cost_estimate=pl.CostEstimate(
            flops=flops, transcendentals=0, bytes_accessed=bytes_accessed),
    )(adj, z, b, w)


def _aggregate(adj, z, b, *, tm, tk, out_dtype):
    n = adj.shape[0]
    c = z.shape[1]
    flops = 2 * n * n * c
    bytes_accessed = (
        n * n * adj.dtype.itemsize
        + n * c * z.dtype.itemsize          # resident Z2, read once
        + n * c * jnp.dtype(out_dtype).itemsize)
    return pl.pallas_call(
        functools.partial(_aggregate_kernel, tk=tk),
        out_shape=jax.ShapeDtypeStruct((n, c), out_dtype),
        grid=(n // tm, n // tk),
        in_specs=[
            pl.BlockSpec((tm, tk), lambda i, k: (i, k)),   # Â tile
            pl.BlockSpec((n, c), lambda i, k: (0, 0)),     # Z2 (resident)
            pl.BlockSpec((1, c), lambda i, k: (0, 0)),     # bias
        ],
        out_specs=pl.BlockSpec((tm, c), lambda i, k: (i, 0)),
        compiler_params=pltpu.CompilerParams(
            dimension_semantics=("parallel", "arbitrary"),
            vmem_limit_bytes=_VMEM_LIMIT_BYTES),
        cost_estimate=pl.CostEstimate(
            flops=flops, transcendentals=0, bytes_accessed=bytes_accessed),
    )(adj, z, b)


# --------------------------------------------------------------------------- #
# Glue (plain JAX): normalized adjacency, padding, tile selection
# --------------------------------------------------------------------------- #
def gcn_normalized_adj(edge_index, num_nodes):
    """Dense Â = D̂^{-1/2}(A + I)D̂^{-1/2}; adj[dst, src] convention.

    Self-loops are added only where missing (PyG add_remaining_self_loops).
    Computed in f32; cast to bf16 only at the MXU boundary.
    """
    src, dst = edge_index[0], edge_index[1]
    a = jnp.zeros((num_nodes, num_nodes), jnp.float32).at[dst, src].add(1.0)
    diag = jnp.diagonal(a)
    a = a + jnp.diag(jnp.where(diag > 0.0, 0.0, 1.0))
    deg = a.sum(axis=1)
    dinv = jnp.where(deg > 0.0, jax.lax.rsqrt(deg), 0.0)
    return dinv[:, None] * a * dinv[None, :]


def _round_up(v, m):
    return ((v + m - 1) // m) * m


def _pad2(a, shape):
    return jnp.pad(a, [(0, s - d) for d, s in zip(a.shape, shape)])


def _choose_tiles(n):
    """Asymmetric aggregate tiles (tm, tk) with tk >= tm; n_pad divisible by both."""
    if n <= 256:
        return 256, 256, 256
    if n <= 512:
        return 512, 512, 512
    if n <= 1024:
        return 1024, 512, 1024
    return _round_up(n, 1024), 512, 1024


# --------------------------------------------------------------------------- #
# Encoder forward
# --------------------------------------------------------------------------- #
def encoder_forward(x, edge_index, params):
    n, in_c = x.shape
    hid = params["w1"].shape[1]
    out_c = params["w2"].shape[1]

    lane = 128
    n_pad, tm, tk = _choose_tiles(n)
    in_p = _round_up(in_c, lane)
    hid_p = _round_up(hid, lane)
    out2_p = _round_up(2 * out_c, lane)

    # Normalized adjacency (f32 math), then pad + cast to bf16 MXU operand.
    adj = gcn_normalized_adj(edge_index, n)
    adj = _pad2(adj, (n_pad, n_pad)).astype(jnp.bfloat16)

    xb = _pad2(x.astype(jnp.float32), (n_pad, in_p)).astype(jnp.bfloat16)

    w1 = _pad2(params["w1"], (in_p, hid_p)).astype(jnp.bfloat16)
    b1 = _pad2(params["b1"], (1, hid_p)).astype(jnp.float32)

    # Fuse conv_mu / conv_logstd into one wide matmul: [W2 || W3], [b2 || b3].
    w23 = jnp.concatenate([params["w2"], params["w3"]], axis=1)
    b23 = jnp.concatenate([params["b2"], params["b3"]], axis=1)
    w23 = _pad2(w23, (hid_p, out2_p)).astype(jnp.bfloat16)
    b23 = _pad2(b23, (1, out2_p)).astype(jnp.float32)

    # Stage 0: Z1 = X W1   (streaming linear, large row tile)
    tm_lin = min(1024, n_pad)
    z1 = _linear(xb, w1, tm=tm_lin, out_dtype=jnp.bfloat16)

    # Stage 1 (fused): Z2 = relu(Â Z1 + b1) @ [W2 || W3]
    #   (h never materialized in HBM; Z1 resident in VMEM)
    z2 = _gcn_fused(adj, z1, b1, w23, tm=tm, tk=tk, out_dtype=jnp.bfloat16)

    # Stage 2: [mu || logstd] = Â Z2 + [b2 || b3]   (Z2 resident, f32 accum in out)
    ml = _aggregate(adj, z2, b23, tm=tm, tk=tk, out_dtype=jnp.float32)

    mu = ml[:n, :out_c].astype(x.dtype)
    logstd = ml[:n, out_c:2 * out_c].astype(x.dtype)
    return mu, logstd


# --------------------------------------------------------------------------- #
# Parameter init (Glorot weights, small biases)
# --------------------------------------------------------------------------- #
def init_params(key, in_channels, hidden_channels, out_channels,
                dtype=jnp.float32):
    k = jax.random.split(key, 6)

    def glorot(kk, fan_in, fan_out):
        lim = jnp.sqrt(6.0 / (fan_in + fan_out))
        return jax.random.uniform(kk, (fan_in, fan_out), dtype, -lim, lim)

    return {
        "w1": glorot(k[0], in_channels, hidden_channels),
        "b1": 0.01 * jax.random.normal(k[1], (1, hidden_channels), dtype),
        "w2": glorot(k[2], hidden_channels, out_channels),
        "b2": 0.01 * jax.random.normal(k[3], (1, out_channels), dtype),
        "w3": glorot(k[4], hidden_channels, out_channels),
        "b3": 0.01 * jax.random.normal(k[5], (1, out_channels), dtype),
    }


if __name__ == "__main__":
    N, IN_C, HID_C, OUT_C = 32, 16, 32, 16

    key = jax.random.PRNGKey(0)
    kx, kp, ke = jax.random.split(key, 3)

    x = jax.random.normal(kx, (N, IN_C), jnp.float32)

    # Deterministic undirected graph: ring + a few random symmetric chords.
    ring_src = jnp.arange(N)
    ring_dst = (ring_src + 1) % N
    chord_src = jax.random.randint(ke, (16,), 0, N)
    chord_dst = (chord_src + 7) % N
    src = jnp.concatenate([ring_src, ring_dst, chord_src, chord_dst])
    dst = jnp.concatenate([ring_dst, ring_src, chord_dst, chord_src])
    edge_index = jnp.stack([src, dst]).astype(jnp.int32)

    params = init_params(kp, IN_C, HID_C, OUT_C)

    mu, logstd = jax.jit(encoder_forward)(x, edge_index, params)
    jax.block_until_ready((mu, logstd))

    # Cheap sanity check against a pure-JAX f32 reference (bf16 MXU tolerance).
    adj_ref = gcn_normalized_adj(edge_index, N)
    h_ref = jax.nn.relu(adj_ref @ (x @ params["w1"]) + params["b1"])
    mu_ref = adj_ref @ (h_ref @ params["w2"]) + params["b2"]
    ls_ref = adj_ref @ (h_ref @ params["w3"]) + params["b3"]
    assert mu.shape == (N, OUT_C) and logstd.shape == (N, OUT_C)
    assert bool(jnp.all(jnp.isfinite(mu))) and bool(jnp.all(jnp.isfinite(logstd)))
    assert float(jnp.max(jnp.abs(mu - mu_ref))) < 5e-2
    assert float(jnp.max(jnp.abs(logstd - ls_ref))) < 5e-2
    print("KERNEL_OK")
</pallas_src>

<mosaic_0001>
module attributes {stable_mosaic.version = 11 : i64} {
  func.func private @main(%arg0: i32) attributes {dimension_semantics = [#tpu.dimension_semantics<core_parallel>], iteration_bounds = array<i64: 2>, tpu.core_type = #tpu.core_type<sc_scalar_subcore>, window_params = []} {
    return
  }
}

module attributes {stable_mosaic.version = 11 : i64} {
  func.func private @main(%arg0: i32) attributes {dimension_semantics = [#tpu.dimension_semantics<core_parallel>], iteration_bounds = array<i64: 2>, tpu.core_type = #tpu.core_type<sc_scalar_subcore>, window_params = []} {
    return
  }
}

module attributes {stable_mosaic.version = 11 : i64} {
  func.func @_linear_kernel(%arg0: i32, %arg1: memref<256x128xbf16, #tpu.memory_space<vmem>>, %arg2: memref<128x128xbf16, #tpu.memory_space<vmem>>, %arg3: memref<256x128xbf16, #tpu.memory_space<vmem>>) attributes {dimension_semantics = [#tpu.dimension_semantics<parallel>], iteration_bounds = array<i64: 1>, scalar_prefetch = 0 : i64, scratch_operands = 0 : i64, tpu.core_type = #tpu.core_type<tc>, window_params = [{transform_indices = @transform_0, window_bounds = array<i64: 256, 128>}, {pipeline_mode = #tpu.pipeline_mode<synchronous>, transform_indices = @transform_1, window_bounds = array<i64: 128, 128>}, {transform_indices = @transform_2, window_bounds = array<i64: 256, 128>}]} {
    %c0 = arith.constant 0 : index
    %c0_0 = arith.constant 0 : index
    %0 = vector.load %arg1[%c0, %c0_0] : memref<256x128xbf16, #tpu.memory_space<vmem>>, vector<256x128xbf16>
    %c0_1 = arith.constant 0 : index
    %c0_2 = arith.constant 0 : index
    %1 = vector.load %arg2[%c0_1, %c0_2] : memref<128x128xbf16, #tpu.memory_space<vmem>>, vector<128x128xbf16>
    %cst = arith.constant dense<0.000000e+00> : vector<256x128xf32>
    %2 = tpu.matmul %0, %1, %cst {dimension_numbers = #tpu.dot_dimension_numbers<[1], [0], [0], [1], [0, 0, 1, 1], [], []>} : vector<256x128xbf16>, vector<128x128xbf16>, vector<256x128xf32> -> vector<256x128xf32>
    %3 = arith.truncf %2 : vector<256x128xf32> to vector<256x128xbf16>
    %c0_3 = arith.constant 0 : index
    %c0_4 = arith.constant 0 : index
    %4 = vector.load %arg3[%c0_3, %c0_4] : memref<256x128xbf16, #tpu.memory_space<vmem>>, vector<256x128xbf16>
    tpu.vector_store %arg3[%c0_3, %c0_4], %3 {strides = array<i32>} : memref<256x128xbf16, #tpu.memory_space<vmem>>, vector<256x128xbf16>,
    return
  }
  func.func @transform_0(%arg0: i32) -> (i32, i32) {
    %c0_i32 = arith.constant 0 : i32
    %c0_i32_0 = arith.constant 0 : i32
    return %arg0, %c0_i32 : i32, i32
  }
  func.func @transform_1(%arg0: i32) -> (i32, i32) {
    %c0_i32 = arith.constant 0 : i32
    %c0_i32_0 = arith.constant 0 : i32
    %c0_i32_1 = arith.constant 0 : i32
    return %c0_i32, %c0_i32_0 : i32, i32
  }
  func.func @transform_2(%arg0: i32) -> (i32, i32) {
    %c0_i32 = arith.constant 0 : i32
    %c0_i32_0 = arith.constant 0 : i32
    return %arg0, %c0_i32 : i32, i32
  }
}

module attributes {stable_mosaic.version = 11 : i64} {
  func.func @_aggregate_kernel(%arg0: i32, %arg1: i32, %arg2: memref<256x256xbf16, #tpu.memory_space<vmem>>, %arg3: memref<256x128xbf16, #tpu.memory_space<vmem>>, %arg4: memref<1x128xf32, #tpu.memory_space<vmem>>, %arg5: memref<256x128xf32, #tpu.memory_space<vmem>>) attributes {dimension_semantics = [#tpu.dimension_semantics<parallel>, #tpu.dimension_semantics<arbitrary>], iteration_bounds = array<i64: 1, 1>, scalar_prefetch = 0 : i64, scratch_operands = 0 : i64, tpu.core_type = #tpu.core_type<tc>, window_params = [{transform_indices = @transform_0, window_bounds = array<i64: 256, 256>}, {pipeline_mode = #tpu.pipeline_mode<synchronous>, transform_indices = @transform_1, window_bounds = array<i64: 256, 128>}, {pipeline_mode = #tpu.pipeline_mode<synchronous>, transform_indices = @transform_2, window_bounds = array<i64: 1, 128>}, {transform_indices = @transform_3, window_bounds = array<i64: 256, 128>}]} {
    %c256_i32 = arith.constant 256 : i32
    %0 = arith.muli %arg1, %c256_i32 : i32
    %1 = tpu.assume_multiple %0, 256 : i32
    %c0 = arith.constant 0 : index
    %c0_0 = arith.constant 0 : index
    %2 = vector.load %arg2[%c0, %c0_0] : memref<256x256xbf16, #tpu.memory_space<vmem>>, vector<256x256xbf16>
    %3 = arith.index_cast %1 : i32 to index
    %c0_1 = arith.constant 0 : index
    %4 = vector.load %arg3[%3, %c0_1] : memref<256x128xbf16, #tpu.memory_space<vmem>>, vector<256x128xbf16>
    %cst = arith.constant dense<0.000000e+00> : vector<256x128xf32>
    %5 = tpu.matmul %2, %4, %cst {dimension_numbers = #tpu.dot_dimension_numbers<[1], [0], [0], [1], [0, 0, 1, 1], [], []>} : vector<256x256xbf16>, vector<256x128xbf16>, vector<256x128xf32> -> vector<256x128xf32>
    %c0_i32 = arith.constant 0 : i32
    %6 = arith.cmpi eq, %arg1, %c0_i32 : i32
    %7 = arith.extui %6 : i1 to i32
    %c0_i32_2 = arith.constant 0 : i32
    %8 = arith.cmpi ne, %7, %c0_i32_2 : i32
    scf.if %8 {
      %c0_5 = arith.constant 0 : index
      %c0_6 = arith.constant 0 : index
      %12 = vector.load %arg4[%c0_5, %c0_6] : memref<1x128xf32, #tpu.memory_space<vmem>>, vector<1x128xf32>
      %13 = vector.broadcast %12 : vector<1x128xf32> to vector<256x128xf32>
      %14 = arith.addf %13, %5 : vector<256x128xf32>
      %c0_7 = arith.constant 0 : index
      %c0_8 = arith.constant 0 : index
      %15 = vector.load %arg5[%c0_7, %c0_8] : memref<256x128xf32, #tpu.memory_space<vmem>>, vector<256x128xf32>
      tpu.vector_store %arg5[%c0_7, %c0_8], %14 {strides = array<i32>} : memref<256x128xf32, #tpu.memory_space<vmem>>, vector<256x128xf32>,
    } else {
    }
    %c0_i32_3 = arith.constant 0 : i32
    %9 = arith.cmpi sgt, %arg1, %c0_i32_3 : i32
    %10 = arith.extui %9 : i1 to i32
    %c0_i32_4 = arith.constant 0 : i32
    %11 = arith.cmpi ne, %10, %c0_i32_4 : i32
    scf.if %11 {
      %c0_5 = arith.constant 0 : index
      %c0_6 = arith.constant 0 : index
      %12 = vector.load %arg5[%c0_5, %c0_6] : memref<256x128xf32, #tpu.memory_space<vmem>>, vector<256x128xf32>
      %13 = arith.addf %12, %5 : vector<256x128xf32>
      %c0_7 = arith.constant 0 : index
      %c0_8 = arith.constant 0 : index
      %14 = vector.load %arg5[%c0_7, %c0_8] : memref<256x128xf32, #tpu.memory_space<vmem>>, vector<256x128xf32>
      tpu.vector_store %arg5[%c0_7, %c0_8], %13 {strides = array<i32>} : memref<256x128xf32, #tpu.memory_space<vmem>>, vector<256x128xf32>,
    } else {
    }
    return
  }
  func.func @transform_0(%arg0: i32, %arg1: i32) -> (i32, i32) {
    %c0_i32 = arith.constant 0 : i32
    return %arg0, %arg1 : i32, i32
  }
  func.func @transform_1(%arg0: i32, %arg1: i32) -> (i32, i32) {
    %c0_i32 = arith.constant 0 : i32
    %c0_i32_0 = arith.constant 0 : i32
    %c0_i32_1 = arith.constant 0 : i32
    return %c0_i32, %c0_i32_0 : i32, i32
  }
  func.func @transform_2(%arg0: i32, %arg1: i32) -> (i32, i32) {
    %c0_i32 = arith.constant 0 : i32
    %c0_i32_0 = arith.constant 0 : i32
    %c0_i32_1 = arith.constant 0 : i32
    return %c0_i32, %c0_i32_0 : i32, i32
  }
  func.func @transform_3(%arg0: i32, %arg1: i32) -> (i32, i32) {
    %c0_i32 = arith.constant 0 : i32
    %c0_i32_0 = arith.constant 0 : i32
    return %arg0, %c0_i32 : i32, i32
  }
}

module attributes {stable_mosaic.version = 11 : i64} {
  func.func @_gcn_fused_kernel(%arg0: i32, %arg1: i32, %arg2: memref<256x256xbf16, #tpu.memory_space<vmem>>, %arg3: memref<256x128xbf16, #tpu.memory_space<vmem>>, %arg4: memref<1x128xf32, #tpu.memory_space<vmem>>, %arg5: memref<128x128xbf16, #tpu.memory_space<vmem>>, %arg6: memref<256x128xbf16, #tpu.memory_space<vmem>>, %arg7: memref<256x128xf32, #tpu.memory_space<vmem>>) attributes {dimension_semantics = [#tpu.dimension_semantics<parallel>, #tpu.dimension_semantics<arbitrary>], iteration_bounds = array<i64: 1, 1>, scalar_prefetch = 0 : i64, scratch_operands = 1 : i64, tpu.core_type = #tpu.core_type<tc>, window_params = [{transform_indices = @transform_0, window_bounds = array<i64: 256, 256>}, {pipeline_mode = #tpu.pipeline_mode<synchronous>, transform_indices = @transform_1, window_bounds = array<i64: 256, 128>}, {pipeline_mode = #tpu.pipeline_mode<synchronous>, transform_indices = @transform_2, window_bounds = array<i64: 1, 128>}, {pipeline_mode = #tpu.pipeline_mode<synchronous>, transform_indices = @transform_3, window_bounds = array<i64: 128, 128>}, {transform_indices = @transform_4, window_bounds = array<i64: 256, 128>}]} {
    %c0_i32 = arith.constant 0 : i32
    %0 = arith.cmpi eq, %arg1, %c0_i32 : i32
    %1 = arith.extui %0 : i1 to i32
    %c0_i32_0 = arith.constant 0 : i32
    %2 = arith.cmpi ne, %1, %c0_i32_0 : i32
    scf.if %2 {
      %c0_9 = arith.constant 0 : index
      %c0_10 = arith.constant 0 : index
      %15 = vector.load %arg4[%c0_9, %c0_10] : memref<1x128xf32, #tpu.memory_space<vmem>>, vector<1x128xf32>
      %16 = vector.shape_cast %15 : vector<1x128xf32> to vector<1x128xf32>
      %17 = vector.broadcast %16 : vector<1x128xf32> to vector<256x128xf32>
      %c0_11 = arith.constant 0 : index
      %c0_12 = arith.constant 0 : index
      %18 = vector.load %arg7[%c0_11, %c0_12] : memref<256x128xf32, #tpu.memory_space<vmem>>, vector<256x128xf32>
      tpu.vector_store %arg7[%c0_11, %c0_12], %17 {strides = array<i32>} : memref<256x128xf32, #tpu.memory_space<vmem>>, vector<256x128xf32>,
    } else {
    }
    %c256_i32 = arith.constant 256 : i32
    %3 = arith.muli %arg1, %c256_i32 : i32
    %4 = tpu.assume_multiple %3, 256 : i32
    %c0 = arith.constant 0 : index
    %c0_1 = arith.constant 0 : index
    %5 = vector.load %arg7[%c0, %c0_1] : memref<256x128xf32, #tpu.memory_space<vmem>>, vector<256x128xf32>
    %c0_2 = arith.constant 0 : index
    %c0_3 = arith.constant 0 : index
    %6 = vector.load %arg2[%c0_2, %c0_3] : memref<256x256xbf16, #tpu.memory_space<vmem>>, vector<256x256xbf16>
    %7 = arith.index_cast %4 : i32 to index
    %c0_4 = arith.constant 0 : index
    %8 = vector.load %arg3[%7, %c0_4] : memref<256x128xbf16, #tpu.memory_space<vmem>>, vector<256x128xbf16>
    %cst = arith.constant dense<0.000000e+00> : vector<256x128xf32>
    %9 = tpu.matmul %6, %8, %cst {dimension_numbers = #tpu.dot_dimension_numbers<[1], [0], [0], [1], [0, 0, 1, 1], [], []>} : vector<256x256xbf16>, vector<256x128xbf16>, vector<256x128xf32> -> vector<256x128xf32>
    %10 = arith.addf %5, %9 : vector<256x128xf32>
    %c0_5 = arith.constant 0 : index
    %c0_6 = arith.constant 0 : index
    %11 = vector.load %arg7[%c0_5, %c0_6] : memref<256x128xf32, #tpu.memory_space<vmem>>, vector<256x128xf32>
    tpu.vector_store %arg7[%c0_5, %c0_6], %10 {strides = array<i32>} : memref<256x128xf32, #tpu.memory_space<vmem>>, vector<256x128xf32>,
    %c0_i32_7 = arith.constant 0 : i32
    %12 = arith.cmpi eq, %arg1, %c0_i32_7 : i32
    %13 = arith.extui %12 : i1 to i32
    %c0_i32_8 = arith.constant 0 : i32
    %14 = arith.cmpi ne, %13, %c0_i32_8 : i32
    scf.if %14 {
      %c0_9 = arith.constant 0 : index
      %c0_10 = arith.constant 0 : index
      %15 = vector.load %arg7[%c0_9, %c0_10] : memref<256x128xf32, #tpu.memory_space<vmem>>, vector<256x128xf32>
      %cst_11 = arith.constant 0.000000e+00 : f32
      %16 = vector.broadcast %cst_11 : f32 to vector<256x128xf32>
      %17 = arith.maximumf %15, %16 : vector<256x128xf32>
      %18 = arith.truncf %17 : vector<256x128xf32> to vector<256x128xbf16>
      %c0_12 = arith.constant 0 : index
      %c0_13 = arith.constant 0 : index
      %19 = vector.load %arg5[%c0_12, %c0_13] : memref<128x128xbf16, #tpu.memory_space<vmem>>, vector<128x128xbf16>
      %cst_14 = arith.constant dense<0.000000e+00> : vector<256x128xf32>
      %20 = tpu.matmul %18, %19, %cst_14 {dimension_numbers = #tpu.dot_dimension_numbers<[1], [0], [0], [1], [0, 0, 1, 1], [], []>} : vector<256x128xbf16>, vector<128x128xbf16>, vector<256x128xf32> -> vector<256x128xf32>
      %21 = arith.truncf %20 : vector<256x128xf32> to vector<256x128xbf16>
      %c0_15 = arith.constant 0 : index
      %c0_16 = arith.constant 0 : index
      %22 = vector.load %arg6[%c0_15, %c0_16] : memref<256x128xbf16, #tpu.memory_space<vmem>>, vector<256x128xbf16>
      tpu.vector_store %arg6[%c0_15, %c0_16], %21 {strides = array<i32>} : memref<256x128xbf16, #tpu.memory_space<vmem>>, vector<256x128xbf16>,
    } else {
    }
    return
  }
  func.func @transform_0(%arg0: i32, %arg1: i32) -> (i32, i32) {
    %c0_i32 = arith.constant 0 : i32
    return %arg0, %arg1 : i32, i32
  }
  func.func @transform_1(%arg0: i32, %arg1: i32) -> (i32, i32) {
    %c0_i32 = arith.constant 0 : i32
    %c0_i32_0 = arith.constant 0 : i32
    %c0_i32_1 = arith.constant 0 : i32
    return %c0_i32, %c0_i32_0 : i32, i32
  }
  func.func @transform_2(%arg0: i32, %arg1: i32) -> (i32, i32) {
    %c0_i32 = arith.constant 0 : i32
    %c0_i32_0 = arith.constant 0 : i32
    %c0_i32_1 = arith.constant 0 : i32
    return %c0_i32, %c0_i32_0 : i32, i32
  }
  func.func @transform_3(%arg0: i32, %arg1: i32) -> (i32, i32) {
    %c0_i32 = arith.constant 0 : i32
    %c0_i32_0 = arith.constant 0 : i32
    %c0_i32_1 = arith.constant 0 : i32
    return %c0_i32, %c0_i32_0 : i32, i32
  }
  func.func @transform_4(%arg0: i32, %arg1: i32) -> (i32, i32) {
    %c0_i32 = arith.constant 0 : i32
    %c0_i32_0 = arith.constant 0 : i32
    return %arg0, %c0_i32 : i32, i32
  }
}

</mosaic_0001>

<bundles_post_ra>
// kernel: encoder_forward.3
= control target key start
LH: loop header
LB: loop body
LE: loop exit
PB: predicated region body
PF: predicated region fallthrough
CT: control target
= control target key end

     0   :  { %7 = vsyncpa [#allocation3], 0  ;;  %s1009_s0 = inlined_call_operand.hbm [shape: bf16[256,128], index: 0, kind: input, shape index: {}]   ;;  %s1010_s1 = inlined_call_operand.hbm [shape: bf16[128,128], index: 1, kind: input, shape index: {}]   ;;  %s1011_s2 = inlined_call_operand.hbm [shape: bf16[256,128], index: 2, kind: output, shape index: {}]  }
   0x1   :  { %8 = vsyncpa [#allocation6], 0 }
   0x2   :  { %9 = vsyncpa [#allocation4], 0  ;;  %s944_s9 = smov [#allocation2]   ;;  %s872_s13 = scalar_lea.hbm %s1009_s0, 2048 }
   0x3   :  { %s15_s10 = sshll.u32 %s944_s9, 4  ;;  %p873_p0 = scmp.ne.s32.totalorder %s1009_s0, %s872_s13  ;;  %s16_s10 = int_to_ptr.vmem [resolvable:$true] %s15_s10 }
   0x4   :  { %p876_p1 = scmp.lt.u32.totalorder %s872_s13, %s1009_s0 }
   0x6   :  { %p878_p2 = pnand %p876_p1, %p873_p0 }
   0x8   :  { %881 = shalt.err (!%p878_p2)
}
   0x9   :  { %s882_s18 = scalar_lea.vmem %s16_s10, 2048  ;;  %p887_p4 = scmp.lt.s32.totalorder %s16_s10, %s16_s10 }
   0xa   :  { %p883_p3 = scmp.ne.s32.totalorder %s16_s10, %s882_s18  ;;  %p888_p5 = scmp.lt.s32.totalorder %s882_s18, %s882_s18 }
   0xc   :  { %p889_p6 = por %p888_p5, %p887_p4 }
   0xe   :  { %p890_p7 = pnand %p889_p6, %p883_p3 }
  0x10   :  { %893 = shalt.err (!%p890_p7)
}
  0x11   :  { %s945_s19 = smov 64   ;;  %s946_s20 = smov 4  }
  0x12   :  { %21 = dma.hbm_to_vmem [thread:$0]  %s1009_s0, 2048, %s16_s10, [#allocation3], %s945_s19, %s945_s19, %s946_s20  }
  0x13   :  { %s947_s23 = smov [#allocation5]   ;;  %s894_s27 = scalar_lea.hbm %s1010_s1, 1024 }
  0x14   :  { %s27_s24 = sshll.u32 %s947_s23, 4  ;;  %p895_p8 = scmp.ne.s32.totalorder %s1010_s1, %s894_s27  ;;  %s28_s24 = int_to_ptr.vmem [resolvable:$true] %s27_s24 }
  0x15   :  { %p898_p9 = scmp.lt.u32.totalorder %s894_s27, %s1010_s1 }
  0x17   :  { %p900_p10 = pnand %p898_p9, %p895_p8 }
  0x19   :  { %903 = shalt.err (!%p900_p10)
}
  0x1a   :  { %s904_s4 = scalar_lea.vmem %s28_s24, 1024  ;;  %p909_p12 = scmp.lt.s32.totalorder %s28_s24, %s28_s24 }
  0x1b   :  { %p905_p11 = scmp.ne.s32.totalorder %s28_s24, %s904_s4  ;;  %p910_p13 = scmp.lt.s32.totalorder %s904_s4, %s904_s4 }
  0x1d   :  { %p911_p0 = por %p910_p13, %p909_p12 }
  0x1f   :  { %p912_p1 = pnand %p911_p0, %p905_p11 }
  0x21   :  { %915 = shalt.err (!%p912_p1)
}
  0x22   :  { %33 = dma.hbm_to_vmem [thread:$0]  %s1010_s1, 1024, %s28_s24, [#allocation6], %s945_s19, %s945_s19, %s946_s20  }
  0x23   :  { %938 = dma.done.wait [#allocation3], 2048  }
  0x24   :  { %939 = vsyncadd [#allocation3], 4294965248 }
  0x25   :  { %940 = dma.done.wait [#allocation6], 1024  }
  0x26   :  { %941 = vsyncadd [#allocation6], 4294966272  ;;  %v848_v0 = vld [vmem:[#allocation5] sm:$0xff]   ;;  %v849_v1 = vld [vmem:[#allocation5 + $0x8] sm:$0xff]   ;;  %s948_s1 = smov [#allocation7]  }
  0x27   :  { %779 = vmatprep.subr.bf16.mxu0 %v848_v0  ;;  %827 = vmatprep.subr.bf16.mxu1 %v848_v0  ;;  %v850_v2 = vld [vmem:[#allocation5 + $0x10] sm:$0xff]   ;;  %v851_v3 = vld [vmem:[#allocation5 + $0x18] sm:$0xff]   ;;  %v856_v4 = vld [vmem:[#allocation2] sm:$0xff]   ;;  %s559_s6 = sshll.u32 %s948_s1, 4  ;;  %s560_s6 = int_to_ptr.vmem [resolvable:$true] %s559_s6 }
  0x28   :  { %780 = vmatpush3.bf16.msra.mxu0 %v848_v0  ;;  %835 = vmatpush3.bf16.msra.mxu1 %v848_v0  ;;  %v857_v5 = vld [vmem:[#allocation2 + $0x40] sm:$0xff]   ;;  %v853_v7 = vld [vmem:[#allocation5 + $0x28] sm:$0xff]   ;;  %v854_v8 = vld [vmem:[#allocation5 + $0x30] sm:$0xff]   ;;  %s916_s7 = scalar_lea.vmem %s560_s6, 2048  ;;  %p921_p3 = scmp.lt.s32.totalorder %s560_s6, %s560_s6 }
  0x29   :  { %781 = vmatprep.subr.bf16.mxu0 %v849_v1  ;;  %828 = vmatprep.subr.bf16.mxu1 %v849_v1  ;;  %v852_v6 = vld [vmem:[#allocation5 + $0x20] sm:$0xff]   ;;  %v855_v9 = vld [vmem:[#allocation5 + $0x38] sm:$0xff]   ;;  %v858_v10 = vld [vmem:[#allocation2 + $0x8] sm:$0xff]   ;;  %p917_p2 = scmp.ne.s32.totalorder %s560_s6, %s916_s7  ;;  %p922_p4 = scmp.lt.s32.totalorder %s916_s7, %s916_s7 }
  0x2a   :  { %795 = vmatprep.mubr.bf16.mxu0 %v856_v4  ;;  %811 = vmatprep.mubr.bf16.mxu1 %v857_v5  ;;  %v859_v11 = vld [vmem:[#allocation2 + $0x48] sm:$0xff]   ;;  %v860_v12 = vld [vmem:[#allocation2 + $0x10] sm:$0xff]   ;;  %v862_v14 = vld [vmem:[#allocation2 + $0x18] sm:$0xff]  }
  0x2b   :  { %v861_v13 = vld [vmem:[#allocation2 + $0x50] sm:$0xff]   ;;  %v863_v15 = vld [vmem:[#allocation2 + $0x58] sm:$0xff]   ;;  %v864_v16 = vld [vmem:[#allocation2 + $0x20] sm:$0xff]   ;;  %p923_p5 = por %p922_p4, %p921_p3 }
  0x2c   :  { %782 = vmatpush3.bf16.msra.mxu0 %v849_v1  ;;  %836 = vmatpush3.bf16.msra.mxu1 %v849_v1  ;;  %v865_v17 = vld [vmem:[#allocation2 + $0x60] sm:$0xff]   ;;  %v866_v18 = vld [vmem:[#allocation2 + $0x28] sm:$0xff]   ;;  %v868_v20 = vld [vmem:[#allocation2 + $0x30] sm:$0xff]  }
  0x2d   :  { %783 = vmatprep.subr.bf16.mxu0 %v850_v2  ;;  %829 = vmatprep.subr.bf16.mxu1 %v850_v2  ;;  %v867_v19 = vld [vmem:[#allocation2 + $0x68] sm:$0xff]   ;;  %v869_v21 = vld [vmem:[#allocation2 + $0x70] sm:$0xff]   ;;  %v870_v22 = vld [vmem:[#allocation2 + $0x38] sm:$0xff]   ;;  %p924_p6 = pnand %p923_p5, %p917_p2 }
  0x2e   :  { %v871_v23 = vld [vmem:[#allocation2 + $0x78] sm:$0xff]  }
  0x30   :  { %784 = vmatpush3.bf16.msra.mxu0 %v850_v2  ;;  %837 = vmatpush3.bf16.msra.mxu1 %v850_v2 }
  0x31   :  { %785 = vmatprep.subr.bf16.mxu0 %v851_v3  ;;  %830 = vmatprep.subr.bf16.mxu1 %v851_v3 }
  0x34   :  { %786 = vmatpush3.bf16.msra.mxu0 %v851_v3  ;;  %838 = vmatpush3.bf16.msra.mxu1 %v851_v3 }
  0x35   :  { %787 = vmatprep.subr.bf16.mxu0 %v852_v6  ;;  %831 = vmatprep.subr.bf16.mxu1 %v852_v6 }
  0x38   :  { %788 = vmatpush3.bf16.msra.mxu0 %v852_v6  ;;  %839 = vmatpush3.bf16.msra.mxu1 %v852_v6 }
  0x39   :  { %789 = vmatprep.subr.bf16.mxu0 %v853_v7  ;;  %832 = vmatprep.subr.bf16.mxu1 %v853_v7 }
  0x3c   :  { %790 = vmatpush3.bf16.msra.mxu0 %v853_v7  ;;  %840 = vmatpush3.bf16.msra.mxu1 %v853_v7 }
  0x3d   :  { %791 = vmatprep.subr.bf16.mxu0 %v854_v8  ;;  %833 = vmatprep.subr.bf16.mxu1 %v854_v8 }
  0x40   :  { %792 = vmatpush3.bf16.msra.mxu0 %v854_v8  ;;  %841 = vmatpush3.bf16.msra.mxu1 %v854_v8 }
  0x41   :  { %793 = vmatprep.subr.bf16.mxu0 %v855_v9  ;;  %834 = vmatprep.subr.bf16.mxu1 %v855_v9 }
  0x44   :  { %794 = vmatpush3.bf16.msra.mxu0 %v855_v9  ;;  %842 = vmatpush3.bf16.msra.mxu1 %v855_v9 }
  0x47   :  { %796 = vmatmul.mubr.bf16.vlgmr.msra.gmra.mrb[0].mxu0 %v858_v10  ;;  %812 = vmatmul.mubr.bf16.vlgmr.msra.gmra.mrb[0].mxu1 %v859_v11 }
  0x48   :  { %799 = vmatprep.mubr.bf16.mxu0 %v860_v12  ;;  %815 = vmatprep.mubr.bf16.mxu1 %v861_v13 }
  0x4f   :  { %800 = vmatmul.mubr.bf16.gmra.mrb[4].mxu0 %v862_v14  ;;  %816 = vmatmul.mubr.bf16.gmra.mrb[4].mxu1 %v863_v15 }
  0x50   :  { %803 = vmatprep.mubr.bf16.mxu0 %v864_v16  ;;  %819 = vmatprep.mubr.bf16.mxu1 %v865_v17 }
  0x57   :  { %804 = vmatmul.mubr.bf16.gmra.mrb[8].mxu0 %v866_v18  ;;  %820 = vmatmul.mubr.bf16.gmra.mrb[8].mxu1 %v867_v19 }
  0x58   :  { %807 = vmatprep.mubr.bf16.mxu0 %v868_v20  ;;  %823 = vmatprep.mubr.bf16.mxu1 %v869_v21 }
  0x5f   :  { %808 = vmatmul.mubr.bf16.gmra.mrb[12].mxu0 %v870_v22  ;;  %824 = vmatmul.mubr.bf16.gmra.mrb[12].mxu1 %v871_v23 }
 0x11a   :  { %v797_v24 = vpop.f32.mrb[0].mxu0  ;;  %v813_v25 = vpop.f32.mrb[0].mxu1 }
 0x11b   :  { %v267_v26 = vpop.f32.mrb[1].mxu0  ;;  %v331_v27 = vpop.f32.mrb[1].mxu1 }
 0x11c   :  { %v798_v28 = vpop.f32.mrb[2].mxu0  ;;  %v814_v29 = vpop.f32.mrb[2].mxu1 }
 0x11d   :  { %v668_v30 = vpack.c.bf16 %v798_v28, %v797_v24  ;;  %v708_v31 = vpack.c.bf16 %v814_v29, %v813_v25  ;;  %v270_v32 = vpop.f32.mrb[3].mxu0  ;;  %v334_v33 = vpop.f32.mrb[3].mxu1 }
 0x11e   :  { %v663_v34 = vpack.c.bf16 %v270_v32, %v267_v26  ;;  %v703_v35 = vpack.c.bf16 %v334_v33, %v331_v27 }
 0x11f   :  { %740 = vst [vmem:[#allocation7 + $0x8] sm:$0xff] %v668_v30   ;;  %748 = vst [vmem:[#allocation7 + $0x48] sm:$0xff] %v708_v31  }
 0x120   :  { %664 = vst [vmem:[#allocation7] sm:$0xff] %v663_v34   ;;  %747 = vst [vmem:[#allocation7 + $0x40] sm:$0xff] %v703_v35  }
 0x122   :  { %v801_v36 = vpop.f32.mrb[4].mxu0  ;;  %v817_v37 = vpop.f32.mrb[4].mxu1 }
 0x123   :  { %v283_v38 = vpop.f32.mrb[5].mxu0  ;;  %v347_v39 = vpop.f32.mrb[5].mxu1 }
 0x124   :  { %v802_v40 = vpop.f32.mrb[6].mxu0  ;;  %v818_v41 = vpop.f32.mrb[6].mxu1 }
 0x125   :  { %v678_v42 = vpack.c.bf16 %v802_v40, %v801_v36  ;;  %v718_v43 = vpack.c.bf16 %v818_v41, %v817_v37  ;;  %v286_v44 = vpop.f32.mrb[7].mxu0  ;;  %v350_v45 = vpop.f32.mrb[7].mxu1 }
 0x126   :  { %v673_v46 = vpack.c.bf16 %v286_v44, %v283_v38  ;;  %v713_v47 = vpack.c.bf16 %v350_v45, %v347_v39 }
 0x127   :  { %742 = vst [vmem:[#allocation7 + $0x18] sm:$0xff] %v678_v42   ;;  %750 = vst [vmem:[#allocation7 + $0x58] sm:$0xff] %v718_v43  }
 0x128   :  { %741 = vst [vmem:[#allocation7 + $0x10] sm:$0xff] %v673_v46   ;;  %749 = vst [vmem:[#allocation7 + $0x50] sm:$0xff] %v713_v47  }
 0x12a   :  { %v805_v48 = vpop.f32.mrb[8].mxu0  ;;  %v821_v49 = vpop.f32.mrb[8].mxu1 }
 0x12b   :  { %v299_v50 = vpop.f32.mrb[9].mxu0  ;;  %v363_v51 = vpop.f32.mrb[9].mxu1 }
 0x12c   :  { %v806_v52 = vpop.f32.mrb[10].mxu0  ;;  %v822_v53 = vpop.f32.mrb[10].mxu1 }
 0x12d   :  { %v688_v54 = vpack.c.bf16 %v806_v52, %v805_v48  ;;  %v728_v55 = vpack.c.bf16 %v822_v53, %v821_v49  ;;  %v302_v56 = vpop.f32.mrb[11].mxu0  ;;  %v366_v57 = vpop.f32.mrb[11].mxu1 }
 0x12e   :  { %v683_v58 = vpack.c.bf16 %v302_v56, %v299_v50  ;;  %v723_v59 = vpack.c.bf16 %v366_v57, %v363_v51 }
 0x12f   :  { %744 = vst [vmem:[#allocation7 + $0x28] sm:$0xff] %v688_v54   ;;  %752 = vst [vmem:[#allocation7 + $0x68] sm:$0xff] %v728_v55  }
 0x130   :  { %743 = vst [vmem:[#allocation7 + $0x20] sm:$0xff] %v683_v58   ;;  %751 = vst [vmem:[#allocation7 + $0x60] sm:$0xff] %v723_v59  }
 0x132   :  { %v809_v60 = vpop.f32.mrb[12].mxu0  ;;  %v825_v61 = vpop.f32.mrb[12].mxu1 }
 0x133   :  { %v315_v62 = vpop.f32.mrb[13].mxu0  ;;  %v379_v63 = vpop.f32.mrb[13].mxu1 }
 0x134   :  { %v810_v0 = vpop.f32.mrb[14].mxu0  ;;  %v826_v1 = vpop.f32.mrb[14].mxu1 }
 0x135   :  { %v698_v2 = vpack.c.bf16 %v810_v0, %v809_v60  ;;  %v738_v3 = vpack.c.bf16 %v826_v1, %v825_v61  ;;  %v318_v4 = vpop.f32.mrb[15].mxu0  ;;  %v382_v5 = vpop.f32.mrb[15].mxu1 }
 0x136   :  { %v693_v6 = vpack.c.bf16 %v318_v4, %v315_v62  ;;  %v733_v7 = vpack.c.bf16 %v382_v5, %v379_v63 }
 0x137   :  { %746 = vst [vmem:[#allocation7 + $0x38] sm:$0xff] %v698_v2   ;;  %754 = vst [vmem:[#allocation7 + $0x78] sm:$0xff] %v738_v3  }
 0x138   :  { %745 = vst [vmem:[#allocation7 + $0x30] sm:$0xff] %v693_v6   ;;  %753 = vst [vmem:[#allocation7 + $0x70] sm:$0xff] %v733_v7  }
 0x139   :  { %927 = shalt.err (!%p924_p6)
}
 0x13a   :  { %s928_s10 = scalar_lea.hbm %s1011_s2, 2048 }
 0x13b   :  { %p929_p7 = scmp.ne.s32.totalorder %s1011_s2, %s928_s10  ;;  %p932_p8 = scmp.lt.u32.totalorder %s928_s10, %s1011_s2 }
 0x13d   :  { %p934_p9 = pnand %p932_p8, %p929_p7 }
 0x13f   :  { %937 = shalt.err (!%p934_p9)
}
 0x140   :  { %565 = dma.vmem_to_hbm [thread:$0]  %s560_s6, 2048, %s1011_s2, [#allocation4], %s945_s19, %s945_s19, %s946_s20  }
 0x141   :  { %942 = dma.done.wait [#allocation4], 2048  }
 0x142   :  { %943 = vsyncadd [#allocation4], 4294965248 }
 0x143   :  { %569 = vsyncpa [#allocation3], 1 }
 0x144   :  { %570 = vsyncpa [#allocation6], 1 }
 0x145   :  { %571 = vsyncpa [#allocation4], 1 }

// kernel: encoder_forward.5
= control target key start
LH: loop header
LB: loop body
LE: loop exit
PB: predicated region body
PF: predicated region fallthrough
CT: control target
= control target key end

     0   :  { %8 = vsyncpa [#allocation3], 0  ;;  %s1195_s0 = inlined_call_operand.hbm [shape: bf16[256,256], index: 0, kind: input, shape index: {}]   ;;  %s1196_s1 = inlined_call_operand.hbm [shape: bf16[256,128], index: 1, kind: input, shape index: {}]   ;;  %s1197_s2 = inlined_call_operand.hbm [shape: f32[1,128], index: 2, kind: input, shape index: {}]   ;;  %s1198_s3 = inlined_call_operand.hbm [shape: f32[256,128], index: 3, kind: output, shape index: {}]  }
   0x1   :  { %9 = vsyncpa [#allocation6], 0 }
   0x2   :  { %10 = vsyncpa [#allocation4], 0  ;;  %s1079_s12 = smov [#allocation5]   ;;  %s985_s16 = scalar_lea.hbm %s1196_s1, 2048 }
   0x3   :  { %s28_s13 = sshll.u32 %s1079_s12, 4  ;;  %p986_p0 = scmp.ne.s32.totalorder %s1196_s1, %s985_s16  ;;  %s29_s13 = int_to_ptr.vmem [resolvable:$true] %s28_s13 }
   0x4   :  { %p989_p1 = scmp.lt.u32.totalorder %s985_s16, %s1196_s1 }
   0x6   :  { %p991_p2 = pnand %p989_p1, %p986_p0 }
   0x8   :  { %994 = shalt.err (!%p991_p2)
}
   0x9   :  { %s995_s21 = scalar_lea.vmem %s29_s13, 2048  ;;  %p1000_p4 = scmp.lt.s32.totalorder %s29_s13, %s29_s13 }
   0xa   :  { %p996_p3 = scmp.ne.s32.totalorder %s29_s13, %s995_s21  ;;  %p1001_p5 = scmp.lt.s32.totalorder %s995_s21, %s995_s21 }
   0xc   :  { %p1002_p6 = por %p1001_p5, %p1000_p4 }
   0xe   :  { %p1003_p7 = pnand %p1002_p6, %p996_p3 }
  0x10   :  { %1006 = shalt.err (!%p1003_p7)
}
  0x11   :  { %s1080_s22 = smov 64   ;;  %s1081_s23 = smov 4  }
  0x12   :  { %34 = dma.hbm_to_vmem [thread:$0]  %s1196_s1, 2048, %s29_s13, [#allocation6], %s1080_s22, %s1080_s22, %s1081_s23  }
  0x13   :  { %s1082_s26 = smov [#allocation2]   ;;  %s1007_s30 = scalar_lea.hbm %s1195_s0, 4096 }
  0x14   :  { %s16_s27 = sshll.u32 %s1082_s26, 4  ;;  %p1008_p8 = scmp.ne.s32.totalorder %s1195_s0, %s1007_s30  ;;  %s17_s27 = int_to_ptr.vmem [resolvable:$true] %s16_s27 }
  0x15   :  { %p1011_p9 = scmp.lt.u32.totalorder %s1007_s30, %s1195_s0 }
  0x17   :  { %p1013_p10 = pnand %p1011_p9, %p1008_p8 }
  0x19   :  { %1016 = shalt.err (!%p1013_p10)
}
  0x1a   :  { %s1017_s8 = scalar_lea.vmem %s17_s27, 4096  ;;  %p1022_p12 = scmp.lt.s32.totalorder %s17_s27, %s17_s27 }
  0x1b   :  { %p1018_p11 = scmp.ne.s32.totalorder %s17_s27, %s1017_s8  ;;  %p1023_p13 = scmp.lt.s32.totalorder %s1017_s8, %s1017_s8 }
  0x1d   :  { %p1024_p0 = por %p1023_p13, %p1022_p12 }
  0x1f   :  { %p1025_p1 = pnand %p1024_p0, %p1018_p11 }
  0x21   :  { %1028 = shalt.err (!%p1025_p1)
}
  0x22   :  { %s1083_s1 = smov 128   ;;  %s1084_s9 = smov 8  }
  0x23   :  { %22 = dma.hbm_to_vmem [thread:$0]  %s1195_s0, 4096, %s17_s27, [#allocation3], %s1083_s1, %s1083_s1, %s1084_s9  }
  0x24   :  { %s1085_s12 = smov [#allocation7]   ;;  %s1029_s16 = scalar_lea.hbm %s1197_s2, 16 }
  0x25   :  { %s41_s13 = sshll.u32 %s1085_s12, 4  ;;  %p1030_p2 = scmp.ne.s32.totalorder %s1197_s2, %s1029_s16  ;;  %s42_s13 = int_to_ptr.vmem [resolvable:$true] %s41_s13 }
  0x26   :  { %p1033_p3 = scmp.lt.u32.totalorder %s1029_s16, %s1197_s2 }
  0x28   :  { %p1035_p4 = pnand %p1033_p3, %p1030_p2 }
  0x2a   :  { %1038 = shalt.err (!%p1035_p4)
}
  0x2b   :  { %s1039_s21 = scalar_lea.vmem %s42_s13, 16  ;;  %s1043_s0 = scalar_lea.vmem %s42_s13, 32 }
  0x2c   :  { %p1040_p5 = scmp.ne.s32.totalorder %s42_s13, %s1039_s21  ;;  %p1044_p6 = scmp.lt.s32.totalorder %s42_s13, %s42_s13 }
  0x2d   :  { %p1045_p7 = scmp.lt.s32.totalorder %s1043_s0, %s1039_s21 }
  0x2f   :  { %p1046_p8 = por %p1045_p7, %p1044_p6 }
  0x31   :  { %p1047_p9 = pnand %p1046_p8, %p1040_p5 }
  0x33   :  { %1050 = shalt.err (!%p1047_p9)
}
  0x34   :  { %44 = dma.hbm_to_vmem [thread:$0]  %s1197_s2, 16, %s42_s13, [#allocation6]  }
  0x35   :  { %1073 = dma.done.wait [#allocation3], 4096  }
  0x36   :  { %1074 = vsyncadd [#allocation3], 4294963200 }
  0x37   :  { %1075 = dma.done.wait [#allocation6], 2064  }
  0x38   :  { %1076 = vsyncadd [#allocation6], 4294965232  ;;  %v921_v0 = vld [vmem:[#allocation5 + $0x40] sm:$0xff]   ;;  %v923_v2 = vld [vmem:[#allocation5 + $0x48] sm:$0xff]   ;;  %s1086_s2 = smov [#allocation8]  }
  0x39   :  { %v922_v1 = vld [vmem:[#allocation5] sm:$0xff]   ;;  %785 = vmatprep.subr.bf16.mxu0 %v921_v0  ;;  %897 = vmatprep.subr.bf16.mxu1 %v921_v0  ;;  %v924_v3 = vld [vmem:[#allocation5 + $0x8] sm:$0xff]   ;;  %v925_v4 = vld [vmem:[#allocation5 + $0x50] sm:$0xff]   ;;  %s721_s24 = sshll.u32 %s1086_s2, 4  ;;  %s722_s24 = int_to_ptr.vmem [resolvable:$true] %s721_s24 }
  0x3a   :  { %786 = vmatpush3.bf16.msra.mxu0 %v922_v1  ;;  %905 = vmatpush3.bf16.msra.mxu1 %v922_v1  ;;  %v926_v5 = vld [vmem:[#allocation5 + $0x10] sm:$0xff]   ;;  %v927_v6 = vld [vmem:[#allocation5 + $0x58] sm:$0xff]   ;;  %v929_v8 = vld [vmem:[#allocation5 + $0x60] sm:$0xff]   ;;  %s1051_s25 = scalar_lea.vmem %s722_s24, 4096  ;;  %p1056_p11 = scmp.lt.s32.totalorder %s722_s24, %s722_s24 }
  0x3b   :  { %787 = vmatprep.subr.bf16.mxu0 %v923_v2  ;;  %898 = vmatprep.subr.bf16.mxu1 %v923_v2  ;;  %v928_v7 = vld [vmem:[#allocation5 + $0x18] sm:$0xff]   ;;  %v930_v9 = vld [vmem:[#allocation5 + $0x20] sm:$0xff]   ;;  %v931_v10 = vld [vmem:[#allocation5 + $0x68] sm:$0xff]   ;;  %p1052_p10 = scmp.ne.s32.totalorder %s722_s24, %s1051_s25  ;;  %p1057_p12 = scmp.lt.s32.totalorder %s1051_s25, %s1051_s25 }
  0x3c   :  { %v939_v11 = vld [vmem:[#allocation2 + $0x4] ss:$8 sps:$4 sm:$0xff]   ;;  %v933_v14 = vld [vmem:[#allocation5 + $0x70] sm:$0xff]   ;;  %v935_v16 = vld [vmem:[#allocation5 + $0x78] sm:$0xff]  }
  0x3d   :  { %v942_v12 = vld [vmem:[#allocation2 + $0x84] ss:$8 sps:$4 sm:$0xff]   ;;  %412 = vmatprep.mubr.bf16.mxu0 %v939_v11  ;;  %v934_v15 = vld [vmem:[#allocation5 + $0x30] sm:$0xff]   ;;  %v936_v17 = vld [vmem:[#allocation5 + $0x38] sm:$0xff]   ;;  %p1058_p13 = por %p1057_p12, %p1056_p11 }
  0x3e   :  { %788 = vmatpush3.bf16.msra.mxu0 %v924_v3  ;;  %906 = vmatpush3.bf16.msra.mxu1 %v924_v3  ;;  %v932_v13 = vld [vmem:[#allocation5 + $0x28] sm:$0xff]   ;;  %v943_v20 = vld [vmem:[#allocation2 + $0x14] ss:$8 sps:$4 sm:$0xff]   ;;  %v947_v22 = vld [vmem:[#allocation2 + $0x10] ss:$8 sps:$4 sm:$0xff]  }
  0x3f   :  { %789 = vmatprep.subr.bf16.mxu0 %v925_v4  ;;  %899 = vmatprep.subr.bf16.mxu1 %v925_v4  ;;  %v937_v18 = vld [vmem:[#allocation2] ss:$8 sps:$4 sm:$0xff]   ;;  %v945_v21 = vld [vmem:[#allocation2 + $0x94] ss:$8 sps:$4 sm:$0xff]   ;;  %v948_v23 = vld [vmem:[#allocation2 + $0x90] ss:$8 sps:$4 sm:$0xff]   ;;  %p1059_p0 = pnand %p1058_p13, %p1052_p10 }
  0x40   :  { %476 = vmatprep.mubr.bf16.mxu1 %v942_v12  ;;  %v940_v19 = vld [vmem:[#allocation2 + $0x80] ss:$8 sps:$4 sm:$0xff]   ;;  %v949_v24 = vld [vmem:[#allocation2 + $0x24] ss:$8 sps:$4 sm:$0xff]   ;;  %v955_v28 = vld [vmem:[#allocation2 + $0x34] ss:$8 sps:$4 sm:$0xff]  }
  0x41   :  { %v951_v25 = vld [vmem:[#allocation2 + $0xa4] ss:$8 sps:$4 sm:$0xff]   ;;  %v953_v26 = vld [vmem:[#allocation2 + $0x20] ss:$8 sps:$4 sm:$0xff]   ;;  %v957_v29 = vld [vmem:[#allocation2 + $0xb4] ss:$8 sps:$4 sm:$0xff]  }
  0x42   :  { %790 = vmatpush3.bf16.msra.mxu0 %v926_v5  ;;  %907 = vmatpush3.bf16.msra.mxu1 %v926_v5  ;;  %v954_v27 = vld [vmem:[#allocation2 + $0xa0] ss:$8 sps:$4 sm:$0xff]   ;;  %v959_v30 = vld [vmem:[#allocation2 + $0x30] ss:$8 sps:$4 sm:$0xff]   ;;  %v961_v32 = vld [vmem:[#allocation2 + $0x44] ss:$8 sps:$4 sm:$0xff]  }
  0x43   :  { %791 = vmatprep.subr.bf16.mxu0 %v927_v6  ;;  %900 = vmatprep.subr.bf16.mxu1 %v927_v6  ;;  %v960_v31 = vld [vmem:[#allocation2 + $0xb0] ss:$8 sps:$4 sm:$0xff]   ;;  %v963_v33 = vld [vmem:[#allocation2 + $0xc4] ss:$8 sps:$4 sm:$0xff]   ;;  %v965_v34 = vld [vmem:[#allocation2 + $0x40] ss:$8 sps:$4 sm:$0xff]  }
  0x44   :  { %v966_v35 = vld [vmem:[#allocation2 + $0xc0] ss:$8 sps:$4 sm:$0xff]   ;;  %v967_v36 = vld [vmem:[#allocation2 + $0x54] ss:$8 sps:$4 sm:$0xff]   ;;  %v971_v38 = vld [vmem:[#allocation2 + $0x50] ss:$8 sps:$4 sm:$0xff]  }
  0x45   :  { %v969_v37 = vld [vmem:[#allocation2 + $0xd4] ss:$8 sps:$4 sm:$0xff]   ;;  %v972_v39 = vld [vmem:[#allocation2 + $0xd0] ss:$8 sps:$4 sm:$0xff]   ;;  %v973_v40 = vld [vmem:[#allocation2 + $0x64] ss:$8 sps:$4 sm:$0xff]  }
  0x46   :  { %792 = vmatpush3.bf16.msra.mxu0 %v928_v7  ;;  %908 = vmatpush3.bf16.msra.mxu1 %v928_v7  ;;  %v975_v41 = vld [vmem:[#allocation2 + $0xe4] ss:$8 sps:$4 sm:$0xff]   ;;  %v977_v42 = vld [vmem:[#allocation2 + $0x60] ss:$8 sps:$4 sm:$0xff]   ;;  %v979_v44 = vld [vmem:[#allocation2 + $0x74] ss:$8 sps:$4 sm:$0xff]  }
  0x47   :  { %793 = vmatprep.subr.bf16.mxu0 %v929_v8  ;;  %901 = vmatprep.subr.bf16.mxu1 %v929_v8  ;;  %v978_v43 = vld [vmem:[#allocation2 + $0xe0] ss:$8 sps:$4 sm:$0xff]   ;;  %v981_v45 = vld [vmem:[#allocation2 + $0xf4] ss:$8 sps:$4 sm:$0xff]   ;;  %v983_v46 = vld [vmem:[#allocation2 + $0x70] ss:$8 sps:$4 sm:$0xff]  }
  0x48   :  { %v984_v47 = vld [vmem:[#allocation2 + $0xf0] ss:$8 sps:$4 sm:$0xff]   ;;  %v1146_v51 = vld [vmem:[#allocation7] ss:$0 sm:$0xff] }
  0x4a   :  { %794 = vmatpush3.bf16.msra.mxu0 %v930_v9  ;;  %909 = vmatpush3.bf16.msra.mxu1 %v930_v9 }
  0x4b   :  { %795 = vmatprep.subr.bf16.mxu0 %v931_v10  ;;  %902 = vmatprep.subr.bf16.mxu1 %v931_v10 }
  0x4e   :  { %796 = vmatpush3.bf16.msra.mxu0 %v932_v13  ;;  %910 = vmatpush3.bf16.msra.mxu1 %v932_v13 }
  0x4f   :  { %797 = vmatprep.subr.bf16.mxu0 %v933_v14  ;;  %903 = vmatprep.subr.bf16.mxu1 %v933_v14 }
  0x52   :  { %798 = vmatpush3.bf16.msra.mxu0 %v934_v15  ;;  %911 = vmatpush3.bf16.msra.mxu1 %v934_v15 }
  0x53   :  { %799 = vmatprep.subr.bf16.mxu0 %v935_v16  ;;  %904 = vmatprep.subr.bf16.mxu1 %v935_v16 }
  0x56   :  { %800 = vmatpush3.bf16.msra.mxu0 %v936_v17  ;;  %912 = vmatpush3.bf16.msra.mxu1 %v936_v17 }
  0x59   :  { %413 = vmatmul.mubr.bf16.vlgmr.msra.gmra.mrb[0].mxu0 %v937_v18  ;;  %477 = vmatmul.mubr.bf16.vlgmr.msra.gmra.mrb[0].mxu1 %v940_v19 }
  0x5a   :  { %420 = vmatprep.mubr.bf16.mxu0 %v943_v20  ;;  %484 = vmatprep.mubr.bf16.mxu1 %v945_v21 }
  0x61   :  { %421 = vmatmul.mubr.bf16.gmra.mrb[4].mxu0 %v947_v22  ;;  %485 = vmatmul.mubr.bf16.gmra.mrb[4].mxu1 %v948_v23 }
  0x62   :  { %428 = vmatprep.mubr.bf16.mxu0 %v949_v24  ;;  %492 = vmatprep.mubr.bf16.mxu1 %v951_v25 }
  0x69   :  { %429 = vmatmul.mubr.bf16.gmra.mrb[8].mxu0 %v953_v26  ;;  %493 = vmatmul.mubr.bf16.gmra.mrb[8].mxu1 %v954_v27 }
  0x6a   :  { %436 = vmatprep.mubr.bf16.mxu0 %v955_v28  ;;  %500 = vmatprep.mubr.bf16.mxu1 %v957_v29 }
  0x71   :  { %437 = vmatmul.mubr.bf16.gmra.mrb[12].mxu0 %v959_v30  ;;  %501 = vmatmul.mubr.bf16.gmra.mrb[12].mxu1 %v960_v31 }
  0x72   :  { %444 = vmatprep.mubr.bf16.mxu0 %v961_v32  ;;  %508 = vmatprep.mubr.bf16.mxu1 %v963_v33 }
  0x79   :  { %445 = vmatmul.mubr.bf16.gmra.mrb[16].mxu0 %v965_v34  ;;  %509 = vmatmul.mubr.bf16.gmra.mrb[16].mxu1 %v966_v35 }
  0x7a   :  { %452 = vmatprep.mubr.bf16.mxu0 %v967_v36  ;;  %516 = vmatprep.mubr.bf16.mxu1 %v969_v37 }
  0x81   :  { %453 = vmatmul.mubr.bf16.gmra.mrb[20].mxu0 %v971_v38  ;;  %517 = vmatmul.mubr.bf16.gmra.mrb[20].mxu1 %v972_v39 }
  0x82   :  { %460 = vmatprep.mubr.bf16.mxu0 %v973_v40  ;;  %524 = vmatprep.mubr.bf16.mxu1 %v975_v41 }
  0x89   :  { %461 = vmatmul.mubr.bf16.gmra.mrb[24].mxu0 %v977_v42  ;;  %525 = vmatmul.mubr.bf16.gmra.mrb[24].mxu1 %v978_v43 }
  0x8a   :  { %468 = vmatprep.mubr.bf16.mxu0 %v979_v44  ;;  %532 = vmatprep.mubr.bf16.mxu1 %v981_v45 }
  0x91   :  { %469 = vmatmul.mubr.bf16.gmra.mrb[28].mxu0 %v983_v46  ;;  %533 = vmatmul.mubr.bf16.gmra.mrb[28].mxu1 %v984_v47 }
 0x12c   :  { %v801_v48 = vpop.f32.mrb[0].mxu0  ;;  %v849_v49 = vpop.f32.mrb[0].mxu1 }
 0x12d   :  { %v802_v50 = vpop.f32.mrb[1].mxu0  ;;  %v850_v52 = vpop.f32.mrb[1].mxu1 }
 0x12e   :  { %v803_v53 = vadd.f32 %v802_v50, %v801_v48  ;;  %v851_v54 = vadd.f32 %v850_v52, %v849_v49  ;;  %v804_v55 = vpop.f32.mrb[2].mxu0  ;;  %v852_v56 = vpop.f32.mrb[2].mxu1 }
 0x12f   :  { %v805_v57 = vpop.f32.mrb[3].mxu0  ;;  %v853_v58 = vpop.f32.mrb[3].mxu1 }
 0x130   :  { %v552_v59 = vadd.f32 %v803_v53, %v1146_v51  ;;  %v568_v60 = vadd.f32 %v851_v54, %v1146_v51  ;;  %v806_v61 = vadd.f32 %v805_v57, %v804_v55  ;;  %v854_v62 = vadd.f32 %v853_v58, %v852_v56 }
 0x132   :  { %584 = vst [vmem:[#allocation8] sm:$0xff] %v552_v59  ;;  %600 = vst [vmem:[#allocation8 + $0x80] sm:$0xff] %v568_v60  ;;  %v553_v63 = vadd.f32 %v806_v61, %v1146_v51  ;;  %v569_v0 = vadd.f32 %v854_v62, %v1146_v51 }
 0x134   :  { %585 = vst [vmem:[#allocation8 + $0x8] sm:$0xff] %v553_v63  ;;  %601 = vst [vmem:[#allocation8 + $0x88] sm:$0xff] %v569_v0  ;;  %v807_v1 = vpop.f32.mrb[4].mxu0  ;;  %v855_v2 = vpop.f32.mrb[4].mxu1 }
 0x135   :  { %v808_v3 = vpop.f32.mrb[5].mxu0  ;;  %v856_v4 = vpop.f32.mrb[5].mxu1 }
 0x136   :  { %v809_v5 = vadd.f32 %v808_v3, %v807_v1  ;;  %v857_v6 = vadd.f32 %v856_v4, %v855_v2  ;;  %v810_v7 = vpop.f32.mrb[6].mxu0  ;;  %v858_v8 = vpop.f32.mrb[6].mxu1 }
 0x137   :  { %v811_v9 = vpop.f32.mrb[7].mxu0  ;;  %v859_v10 = vpop.f32.mrb[7].mxu1 }
 0x138   :  { %v554_v11 = vadd.f32 %v809_v5, %v1146_v51  ;;  %v570_v12 = vadd.f32 %v857_v6, %v1146_v51  ;;  %v812_v13 = vadd.f32 %v811_v9, %v810_v7  ;;  %v860_v14 = vadd.f32 %v859_v10, %v858_v8 }
 0x13a   :  { %586 = vst [vmem:[#allocation8 + $0x10] sm:$0xff] %v554_v11  ;;  %602 = vst [vmem:[#allocation8 + $0x90] sm:$0xff] %v570_v12  ;;  %v555_v15 = vadd.f32 %v812_v13, %v1146_v51  ;;  %v571_v16 = vadd.f32 %v860_v14, %v1146_v51 }
 0x13c   :  { %587 = vst [vmem:[#allocation8 + $0x18] sm:$0xff] %v555_v15  ;;  %603 = vst [vmem:[#allocation8 + $0x98] sm:$0xff] %v571_v16  ;;  %v813_v17 = vpop.f32.mrb[8].mxu0  ;;  %v861_v18 = vpop.f32.mrb[8].mxu1 }
 0x13d   :  { %v814_v19 = vpop.f32.mrb[9].mxu0  ;;  %v862_v20 = vpop.f32.mrb[9].mxu1 }
 0x13e   :  { %v815_v21 = vadd.f32 %v814_v19, %v813_v17  ;;  %v863_v22 = vadd.f32 %v862_v20, %v861_v18  ;;  %v816_v23 = vpop.f32.mrb[10].mxu0  ;;  %v864_v24 = vpop.f32.mrb[10].mxu1 }
 0x13f   :  { %v817_v25 = vpop.f32.mrb[11].mxu0  ;;  %v865_v26 = vpop.f32.mrb[11].mxu1 }
 0x140   :  { %v556_v27 = vadd.f32 %v815_v21, %v1146_v51  ;;  %v572_v28 = vadd.f32 %v863_v22, %v1146_v51  ;;  %v818_v29 = vadd.f32 %v817_v25, %v816_v23  ;;  %v866_v30 = vadd.f32 %v865_v26, %v864_v24 }
 0x142   :  { %588 = vst [vmem:[#allocation8 + $0x20] sm:$0xff] %v556_v27  ;;  %604 = vst [vmem:[#allocation8 + $0xa0] sm:$0xff] %v572_v28  ;;  %v557_v31 = vadd.f32 %v818_v29, %v1146_v51  ;;  %v573_v32 = vadd.f32 %v866_v30, %v1146_v51 }
 0x144   :  { %589 = vst [vmem:[#allocation8 + $0x28] sm:$0xff] %v557_v31  ;;  %605 = vst [vmem:[#allocation8 + $0xa8] sm:$0xff] %v573_v32  ;;  %v819_v33 = vpop.f32.mrb[12].mxu0  ;;  %v867_v34 = vpop.f32.mrb[12].mxu1 }
 0x145   :  { %v820_v35 = vpop.f32.mrb[13].mxu0  ;;  %v868_v36 = vpop.f32.mrb[13].mxu1 }
 0x146   :  { %v821_v37 = vadd.f32 %v820_v35, %v819_v33  ;;  %v869_v38 = vadd.f32 %v868_v36, %v867_v34  ;;  %v822_v39 = vpop.f32.mrb[14].mxu0  ;;  %v870_v40 = vpop.f32.mrb[14].mxu1 }
 0x147   :  { %v823_v41 = vpop.f32.mrb[15].mxu0  ;;  %v871_v42 = vpop.f32.mrb[15].mxu1 }
 0x148   :  { %v558_v43 = vadd.f32 %v821_v37, %v1146_v51  ;;  %v574_v44 = vadd.f32 %v869_v38, %v1146_v51  ;;  %v824_v45 = vadd.f32 %v823_v41, %v822_v39  ;;  %v872_v46 = vadd.f32 %v871_v42, %v870_v40 }
 0x14a   :  { %590 = vst [vmem:[#allocation8 + $0x30] sm:$0xff] %v558_v43  ;;  %606 = vst [vmem:[#allocation8 + $0xb0] sm:$0xff] %v574_v44  ;;  %v559_v47 = vadd.f32 %v824_v45, %v1146_v51  ;;  %v575_v48 = vadd.f32 %v872_v46, %v1146_v51 }
 0x14c   :  { %591 = vst [vmem:[#allocation8 + $0x38] sm:$0xff] %v559_v47  ;;  %607 = vst [vmem:[#allocation8 + $0xb8] sm:$0xff] %v575_v48  ;;  %v825_v49 = vpop.f32.mrb[16].mxu0  ;;  %v873_v50 = vpop.f32.mrb[16].mxu1 }
 0x14d   :  { %v826_v52 = vpop.f32.mrb[17].mxu0  ;;  %v874_v53 = vpop.f32.mrb[17].mxu1 }
 0x14e   :  { %v827_v54 = vadd.f32 %v826_v52, %v825_v49  ;;  %v875_v55 = vadd.f32 %v874_v53, %v873_v50  ;;  %v828_v56 = vpop.f32.mrb[18].mxu0  ;;  %v876_v57 = vpop.f32.mrb[18].mxu1 }
 0x14f   :  { %v829_v58 = vpop.f32.mrb[19].mxu0  ;;  %v877_v59 = vpop.f32.mrb[19].mxu1 }
 0x150   :  { %v560_v60 = vadd.f32 %v827_v54, %v1146_v51  ;;  %v576_v61 = vadd.f32 %v875_v55, %v1146_v51  ;;  %v830_v62 = vadd.f32 %v829_v58, %v828_v56  ;;  %v878_v63 = vadd.f32 %v877_v59, %v876_v57 }
 0x152   :  { %592 = vst [vmem:[#allocation8 + $0x40] sm:$0xff] %v560_v60  ;;  %608 = vst [vmem:[#allocation8 + $0xc0] sm:$0xff] %v576_v61  ;;  %v561_v0 = vadd.f32 %v830_v62, %v1146_v51  ;;  %v577_v1 = vadd.f32 %v878_v63, %v1146_v51 }
 0x154   :  { %593 = vst [vmem:[#allocation8 + $0x48] sm:$0xff] %v561_v0  ;;  %609 = vst [vmem:[#allocation8 + $0xc8] sm:$0xff] %v577_v1  ;;  %v831_v2 = vpop.f32.mrb[20].mxu0  ;;  %v879_v3 = vpop.f32.mrb[20].mxu1 }
 0x155   :  { %v832_v4 = vpop.f32.mrb[21].mxu0  ;;  %v880_v5 = vpop.f32.mrb[21].mxu1 }
 0x156   :  { %v833_v6 = vadd.f32 %v832_v4, %v831_v2  ;;  %v881_v7 = vadd.f32 %v880_v5, %v879_v3  ;;  %v834_v8 = vpop.f32.mrb[22].mxu0  ;;  %v882_v9 = vpop.f32.mrb[22].mxu1 }
 0x157   :  { %v835_v10 = vpop.f32.mrb[23].mxu0  ;;  %v883_v11 = vpop.f32.mrb[23].mxu1 }
 0x158   :  { %v562_v12 = vadd.f32 %v833_v6, %v1146_v51  ;;  %v578_v13 = vadd.f32 %v881_v7, %v1146_v51  ;;  %v836_v14 = vadd.f32 %v835_v10, %v834_v8  ;;  %v884_v15 = vadd.f32 %v883_v11, %v882_v9 }
 0x15a   :  { %594 = vst [vmem:[#allocation8 + $0x50] sm:$0xff] %v562_v12  ;;  %610 = vst [vmem:[#allocation8 + $0xd0] sm:$0xff] %v578_v13  ;;  %v563_v16 = vadd.f32 %v836_v14, %v1146_v51  ;;  %v579_v17 = vadd.f32 %v884_v15, %v1146_v51 }
 0x15c   :  { %595 = vst [vmem:[#allocation8 + $0x58] sm:$0xff] %v563_v16  ;;  %611 = vst [vmem:[#allocation8 + $0xd8] sm:$0xff] %v579_v17  ;;  %v837_v18 = vpop.f32.mrb[24].mxu0  ;;  %v885_v19 = vpop.f32.mrb[24].mxu1 }
 0x15d   :  { %v838_v20 = vpop.f32.mrb[25].mxu0  ;;  %v886_v21 = vpop.f32.mrb[25].mxu1 }
 0x15e   :  { %v839_v22 = vadd.f32 %v838_v20, %v837_v18  ;;  %v887_v23 = vadd.f32 %v886_v21, %v885_v19  ;;  %v840_v24 = vpop.f32.mrb[26].mxu0  ;;  %v888_v25 = vpop.f32.mrb[26].mxu1 }
 0x15f   :  { %v841_v26 = vpop.f32.mrb[27].mxu0  ;;  %v889_v27 = vpop.f32.mrb[27].mxu1 }
 0x160   :  { %v564_v28 = vadd.f32 %v839_v22, %v1146_v51  ;;  %v580_v29 = vadd.f32 %v887_v23, %v1146_v51  ;;  %v842_v30 = vadd.f32 %v841_v26, %v840_v24  ;;  %v890_v31 = vadd.f32 %v889_v27, %v888_v25 }
 0x162   :  { %596 = vst [vmem:[#allocation8 + $0x60] sm:$0xff] %v564_v28  ;;  %612 = vst [vmem:[#allocation8 + $0xe0] sm:$0xff] %v580_v29  ;;  %v565_v32 = vadd.f32 %v842_v30, %v1146_v51  ;;  %v581_v33 = vadd.f32 %v890_v31, %v1146_v51 }
 0x164   :  { %597 = vst [vmem:[#allocation8 + $0x68] sm:$0xff] %v565_v32  ;;  %613 = vst [vmem:[#allocation8 + $0xe8] sm:$0xff] %v581_v33  ;;  %v843_v34 = vpop.f32.mrb[28].mxu0  ;;  %v891_v35 = vpop.f32.mrb[28].mxu1 }
 0x165   :  { %v844_v36 = vpop.f32.mrb[29].mxu0  ;;  %v892_v37 = vpop.f32.mrb[29].mxu1 }
 0x166   :  { %v845_v38 = vadd.f32 %v844_v36, %v843_v34  ;;  %v893_v39 = vadd.f32 %v892_v37, %v891_v35  ;;  %v846_v40 = vpop.f32.mrb[30].mxu0  ;;  %v894_v41 = vpop.f32.mrb[30].mxu1 }
 0x167   :  { %v847_v42 = vpop.f32.mrb[31].mxu0  ;;  %v895_v43 = vpop.f32.mrb[31].mxu1 }
 0x168   :  { %v566_v44 = vadd.f32 %v845_v38, %v1146_v51  ;;  %v582_v45 = vadd.f32 %v893_v39, %v1146_v51  ;;  %v848_v46 = vadd.f32 %v847_v42, %v846_v40  ;;  %v896_v47 = vadd.f32 %v895_v43, %v894_v41 }
 0x16a   :  { %598 = vst [vmem:[#allocation8 + $0x70] sm:$0xff] %v566_v44  ;;  %614 = vst [vmem:[#allocation8 + $0xf0] sm:$0xff] %v582_v45  ;;  %v567_v48 = vadd.f32 %v848_v46, %v1146_v51  ;;  %v583_v49 = vadd.f32 %v896_v47, %v1146_v51 }
 0x16c   :  { %599 = vst [vmem:[#allocation8 + $0x78] sm:$0xff] %v567_v48  ;;  %615 = vst [vmem:[#allocation8 + $0xf8] sm:$0xff] %v583_v49 }
 0x16d   :  { %1062 = shalt.err (!%p1059_p0)
}
 0x16e   :  { %s1063_s28 = scalar_lea.hbm %s1198_s3, 4096 }
 0x16f   :  { %p1064_p1 = scmp.ne.s32.totalorder %s1198_s3, %s1063_s28  ;;  %p1067_p2 = scmp.lt.u32.totalorder %s1063_s28, %s1198_s3 }
 0x171   :  { %p1069_p3 = pnand %p1067_p2, %p1064_p1 }
 0x173   :  { %1072 = shalt.err (!%p1069_p3)
}
 0x174   :  { %727 = dma.vmem_to_hbm [thread:$0]  %s722_s24, 4096, %s1198_s3, [#allocation4], %s1083_s1, %s1083_s1, %s1084_s9  }
 0x175   :  { %1077 = dma.done.wait [#allocation4], 4096  }
 0x176   :  { %1078 = vsyncadd [#allocation4], 4294963200 }
 0x177   :  { %731 = vsyncpa [#allocation3], 1 }
 0x178   :  { %732 = vsyncpa [#allocation6], 1 }
 0x179   :  { %733 = vsyncpa [#allocation4], 1 }

// kernel: encoder_forward.4
= control target key start
LH: loop header
LB: loop body
LE: loop exit
PB: predicated region body
PF: predicated region fallthrough
CT: control target
= control target key end

     0   :  { %9 = vsyncpa [#allocation4], 0  ;;  %s1957_s0 = inlined_call_operand.hbm [shape: bf16[256,256], index: 0, kind: input, shape index: {}]   ;;  %s1958_s1 = inlined_call_operand.hbm [shape: bf16[256,128], index: 1, kind: input, shape index: {}]   ;;  %s1959_s2 = inlined_call_operand.hbm [shape: f32[1,128], index: 2, kind: input, shape index: {}]   ;;  %s1960_s3 = inlined_call_operand.hbm [shape: bf16[128,128], index: 3, kind: input, shape index: {}]   ;;  %s1961_s4 = inlined_call_operand.hbm [shape: bf16[256,128], index: 4, kind: output, shape index: {}]  }
   0x1   :  { %10 = vsyncpa [#allocation7], 0 }
   0x2   :  { %11 = vsyncpa [#allocation10], 0 }
   0x3   :  { %12 = vsyncpa [#allocation5], 0  ;;  %s1801_s15 = smov [#allocation6]   ;;  %s1683_s19 = scalar_lea.hbm %s1958_s1, 2048 }
   0x4   :  { %s30_s16 = sshll.u32 %s1801_s15, 4  ;;  %p1684_p0 = scmp.ne.s32.totalorder %s1958_s1, %s1683_s19  ;;  %s31_s16 = int_to_ptr.vmem [resolvable:$true] %s30_s16 }
   0x5   :  { %p1687_p1 = scmp.lt.u32.totalorder %s1683_s19, %s1958_s1 }
   0x7   :  { %p1689_p2 = pnand %p1687_p1, %p1684_p0 }
   0x9   :  { %1692 = shalt.err (!%p1689_p2)
}
   0xa   :  { %s1693_s24 = scalar_lea.vmem %s31_s16, 2048  ;;  %p1698_p4 = scmp.lt.s32.totalorder %s31_s16, %s31_s16 }
   0xb   :  { %p1694_p3 = scmp.ne.s32.totalorder %s31_s16, %s1693_s24  ;;  %p1699_p5 = scmp.lt.s32.totalorder %s1693_s24, %s1693_s24 }
   0xd   :  { %p1700_p6 = por %p1699_p5, %p1698_p4 }
   0xf   :  { %p1701_p7 = pnand %p1700_p6, %p1694_p3 }
  0x11   :  { %1704 = shalt.err (!%p1701_p7)
}
  0x12   :  { %s1802_s25 = smov 64   ;;  %s1803_s26 = smov 4  }
  0x13   :  { %36 = dma.hbm_to_vmem [thread:$0]  %s1958_s1, 2048, %s31_s16, [#allocation7], %s1802_s25, %s1802_s25, %s1803_s26  }
  0x14   :  { %s1804_s29 = smov [#allocation3]   ;;  %s1705_s7 = scalar_lea.hbm %s1957_s0, 4096 }
  0x15   :  { %s18_s30 = sshll.u32 %s1804_s29, 4  ;;  %p1706_p8 = scmp.ne.s32.totalorder %s1957_s0, %s1705_s7  ;;  %s19_s30 = int_to_ptr.vmem [resolvable:$true] %s18_s30 }
  0x16   :  { %p1709_p9 = scmp.lt.u32.totalorder %s1705_s7, %s1957_s0 }
  0x18   :  { %p1711_p10 = pnand %p1709_p9, %p1706_p8 }
  0x1a   :  { %1714 = shalt.err (!%p1711_p10)
}
  0x1b   :  { %s1715_s12 = scalar_lea.vmem %s19_s30, 4096  ;;  %p1720_p12 = scmp.lt.s32.totalorder %s19_s30, %s19_s30 }
  0x1c   :  { %p1716_p11 = scmp.ne.s32.totalorder %s19_s30, %s1715_s12  ;;  %p1721_p13 = scmp.lt.s32.totalorder %s1715_s12, %s1715_s12 }
  0x1e   :  { %p1722_p0 = por %p1721_p13, %p1720_p12 }
  0x20   :  { %p1723_p1 = pnand %p1722_p0, %p1716_p11 }
  0x22   :  { %1726 = shalt.err (!%p1723_p1)
}
  0x23   :  { %s1805_s1 = smov 128   ;;  %s1806_s13 = smov 8  }
  0x24   :  { %24 = dma.hbm_to_vmem [thread:$0]  %s1957_s0, 4096, %s19_s30, [#allocation4], %s1805_s1, %s1805_s1, %s1806_s13  }
  0x25   :  { %s1807_s16 = smov [#allocation8]   ;;  %s1808_s18 = smov [#allocation9]  }
  0x26   :  { %s43_s17 = sshll.u32 %s1807_s16, 4  ;;  %s52_s19 = sshll.u32 %s1808_s18, 4  ;;  %s44_s17 = int_to_ptr.vmem [resolvable:$true] %s43_s17  ;;  %s1862_s19 = int_to_ptr.vmem [resolvable:$true] %s52_s19 }
  0x27   :  { %s1727_s22 = scalar_lea.hbm %s1959_s2, 16 }
  0x28   :  { %p1728_p2 = scmp.ne.s32.totalorder %s1959_s2, %s1727_s22  ;;  %p1731_p3 = scmp.lt.u32.totalorder %s1727_s22, %s1959_s2 }
  0x2a   :  { %p1733_p4 = pnand %p1731_p3, %p1728_p2 }
  0x2c   :  { %1736 = shalt.err (!%p1733_p4)
}
  0x2d   :  { %s1737_s0 = scalar_lea.vmem %s44_s17, 16  ;;  %s1741_s29 = scalar_lea.vmem %s44_s17, 32 }
  0x2e   :  { %p1738_p5 = scmp.ne.s32.totalorder %s44_s17, %s1737_s0  ;;  %p1742_p6 = scmp.lt.s32.totalorder %s44_s17, %s44_s17 }
  0x2f   :  { %p1743_p7 = scmp.lt.s32.totalorder %s1741_s29, %s1737_s0 }
  0x31   :  { %p1744_p8 = por %p1743_p7, %p1742_p6 }
  0x33   :  { %p1745_p9 = pnand %p1744_p8, %p1738_p5 }
  0x35   :  { %1748 = shalt.err (!%p1745_p9)
}
  0x36   :  { %46 = dma.hbm_to_vmem [thread:$0]  %s1959_s2, 16, %s44_s17, [#allocation7]  }
  0x37   :  { %s1749_s8 = scalar_lea.hbm %s1960_s3, 1024 }
  0x38   :  { %p1750_p10 = scmp.ne.s32.totalorder %s1960_s3, %s1749_s8  ;;  %p1753_p11 = scmp.lt.u32.totalorder %s1749_s8, %s1960_s3 }
  0x3a   :  { %p1755_p12 = pnand %p1753_p11, %p1750_p10 }
  0x3c   :  { %1758 = shalt.err (!%p1755_p12)
}
  0x3d   :  { %s1759_s1 = scalar_lea.vmem %s1862_s19, 1024  ;;  %p1764_p0 = scmp.lt.s32.totalorder %s1862_s19, %s1862_s19 }
  0x3e   :  { %p1760_p13 = scmp.ne.s32.totalorder %s1862_s19, %s1759_s1  ;;  %p1765_p1 = scmp.lt.s32.totalorder %s1759_s1, %s1759_s1 }
  0x40   :  { %p1766_p2 = por %p1765_p1, %p1764_p0 }
  0x42   :  { %p1767_p3 = pnand %p1766_p2, %p1760_p13 }
  0x44   :  { %1770 = shalt.err (!%p1767_p3)
}
  0x45   :  { %58 = dma.hbm_to_vmem [thread:$0]  %s1960_s3, 1024, %s1862_s19, [#allocation10], %s1802_s25, %s1802_s25, %s1803_s26  }
  0x46   :  { %1793 = dma.done.wait [#allocation4], 4096  }
  0x47   :  { %1794 = vsyncadd [#allocation4], 4294963200 }
  0x48   :  { %1795 = dma.done.wait [#allocation7], 2064  }
  0x49   :  { %1796 = vsyncadd [#allocation7], 4294965232 }
  0x4a   :  { %1797 = dma.done.wait [#allocation10], 1024  }
  0x4b   :  { %1798 = vsyncadd [#allocation10], 4294966272  ;;  %v1611_v0 = vld [vmem:[#allocation6 + $0x40] sm:$0xff]   ;;  %v1613_v2 = vld [vmem:[#allocation6 + $0x48] sm:$0xff]   ;;  %s1809_s3 = smov [#allocation11]  }
  0x4c   :  { %v1612_v1 = vld [vmem:[#allocation6] sm:$0xff]   ;;  %1402 = vmatprep.subr.bf16.mxu0 %v1611_v0  ;;  %1586 = vmatprep.subr.bf16.mxu1 %v1611_v0  ;;  %v1614_v3 = vld [vmem:[#allocation6 + $0x8] sm:$0xff]   ;;  %v1615_v4 = vld [vmem:[#allocation6 + $0x50] sm:$0xff]   ;;  %s1170_s14 = sshll.u32 %s1809_s3, 4  ;;  %s1171_s14 = int_to_ptr.vmem [resolvable:$true] %s1170_s14 }
  0x4d   :  { %1403 = vmatpush3.bf16.msra.mxu0 %v1612_v1  ;;  %1594 = vmatpush3.bf16.msra.mxu1 %v1612_v1  ;;  %v1616_v5 = vld [vmem:[#allocation6 + $0x10] sm:$0xff]   ;;  %v1617_v6 = vld [vmem:[#allocation6 + $0x58] sm:$0xff]   ;;  %v1619_v8 = vld [vmem:[#allocation6 + $0x60] sm:$0xff]   ;;  %s1771_s15 = scalar_lea.vmem %s1171_s14, 2048  ;;  %p1776_p5 = scmp.lt.s32.totalorder %s1171_s14, %s1171_s14 }
  0x4e   :  { %1404 = vmatprep.subr.bf16.mxu0 %v1613_v2  ;;  %1587 = vmatprep.subr.bf16.mxu1 %v1613_v2  ;;  %v1618_v7 = vld [vmem:[#allocation6 + $0x18] sm:$0xff]   ;;  %v1620_v9 = vld [vmem:[#allocation6 + $0x20] sm:$0xff]   ;;  %v1621_v10 = vld [vmem:[#allocation6 + $0x68] sm:$0xff]   ;;  %p1772_p4 = scmp.ne.s32.totalorder %s1171_s14, %s1771_s15  ;;  %p1777_p6 = scmp.lt.s32.totalorder %s1771_s15, %s1771_s15 }
  0x4f   :  { %v1629_v11 = vld [vmem:[#allocation3 + $0x4] ss:$8 sps:$4 sm:$0xff]   ;;  %v1623_v13 = vld [vmem:[#allocation6 + $0x70] sm:$0xff]   ;;  %v1625_v15 = vld [vmem:[#allocation6 + $0x78] sm:$0xff]  }
  0x50   :  { %v1622_v12 = vld [vmem:[#allocation6 + $0x28] sm:$0xff]   ;;  %504 = vmatprep.mubr.bf16.mxu0 %v1629_v11  ;;  %v1624_v14 = vld [vmem:[#allocation6 + $0x30] sm:$0xff]   ;;  %v1626_v16 = vld [vmem:[#allocation6 + $0x38] sm:$0xff]   ;;  %p1778_p7 = por %p1777_p6, %p1776_p5 }
  0x51   :  { %1405 = vmatpush3.bf16.msra.mxu0 %v1614_v3  ;;  %1595 = vmatpush3.bf16.msra.mxu1 %v1614_v3  ;;  %v1627_v17 = vld [vmem:[#allocation3] ss:$8 sps:$4 sm:$0xff]   ;;  %v1659_v18 = vld [vmem:[#allocation3 + $0xc4] ss:$8 sps:$4 sm:$0xff]   ;;  %v1630_v19 = vld [vmem:[#allocation3 + $0x14] ss:$8 sps:$4 sm:$0xff]  }
  0x52   :  { %1406 = vmatprep.subr.bf16.mxu0 %v1615_v4  ;;  %1588 = vmatprep.subr.bf16.mxu1 %v1615_v4  ;;  %v1657_v20 = vld [vmem:[#allocation3 + $0xc0] ss:$8 sps:$4 sm:$0xff]   ;;  %v1663_v21 = vld [vmem:[#allocation3 + $0xd4] ss:$8 sps:$4 sm:$0xff]   ;;  %v1632_v22 = vld [vmem:[#allocation3 + $0x10] ss:$8 sps:$4 sm:$0xff]   ;;  %p1779_p8 = pnand %p1778_p7, %p1772_p4 }
  0x53   :  { %600 = vmatprep.mubr.bf16.mxu1 %v1659_v18  ;;  %v1633_v23 = vld [vmem:[#allocation3 + $0x24] ss:$8 sps:$4 sm:$0xff]   ;;  %v1665_v24 = vld [vmem:[#allocation3 + $0xd0] ss:$8 sps:$4 sm:$0xff]   ;;  %v1635_v29 = vld [vmem:[#allocation3 + $0x20] ss:$8 sps:$4 sm:$0xff]  }
  0x54   :  { %v1669_v25 = vld [vmem:[#allocation3 + $0xe4] ss:$8 sps:$4 sm:$0xff]   ;;  %v1677_v28 = vld [vmem:[#allocation9 + $0x10] sm:$0xff]   ;;  %v1671_v31 = vld [vmem:[#allocation3 + $0xe0] ss:$8 sps:$4 sm:$0xff]  }
  0x55   :  { %1407 = vmatpush3.bf16.msra.mxu0 %v1616_v5  ;;  %1596 = vmatpush3.bf16.msra.mxu1 %v1616_v5  ;;  %v1675_v26 = vld [vmem:[#allocation9] sm:$0xff]   ;;  %v1676_v27 = vld [vmem:[#allocation9 + $0x8] sm:$0xff]   ;;  %v1636_v30 = vld [vmem:[#allocation3 + $0x34] ss:$8 sps:$4 sm:$0xff]  }
  0x56   :  { %1408 = vmatprep.subr.bf16.mxu0 %v1617_v6  ;;  %1589 = vmatprep.subr.bf16.mxu1 %v1617_v6  ;;  %v1672_v32 = vld [vmem:[#allocation3 + $0xf4] ss:$8 sps:$4 sm:$0xff]   ;;  %v1638_v33 = vld [vmem:[#allocation3 + $0x30] ss:$8 sps:$4 sm:$0xff]   ;;  %v1639_v34 = vld [vmem:[#allocation3 + $0x44] ss:$8 sps:$4 sm:$0xff]  }
  0x57   :  { %v1674_v35 = vld [vmem:[#allocation3 + $0xf0] ss:$8 sps:$4 sm:$0xff]   ;;  %v1641_v36 = vld [vmem:[#allocation3 + $0x40] ss:$8 sps:$4 sm:$0xff]   ;;  %v1642_v37 = vld [vmem:[#allocation3 + $0x54] ss:$8 sps:$4 sm:$0xff]  }
  0x58   :  { %v1644_v38 = vld [vmem:[#allocation3 + $0x50] ss:$8 sps:$4 sm:$0xff]   ;;  %v1645_v39 = vld [vmem:[#allocation3 + $0x64] ss:$8 sps:$4 sm:$0xff]   ;;  %v1647_v40 = vld [vmem:[#allocation3 + $0x60] ss:$8 sps:$4 sm:$0xff]  }
  0x59   :  { %1409 = vmatpush3.bf16.msra.mxu0 %v1618_v7  ;;  %1597 = vmatpush3.bf16.msra.mxu1 %v1618_v7  ;;  %v1648_v41 = vld [vmem:[#allocation3 + $0x74] ss:$8 sps:$4 sm:$0xff]   ;;  %v1650_v42 = vld [vmem:[#allocation3 + $0x70] ss:$8 sps:$4 sm:$0xff]   ;;  %v1651_v43 = vld [vmem:[#allocation3 + $0x84] ss:$8 sps:$4 sm:$0xff]  }
  0x5a   :  { %1410 = vmatprep.subr.bf16.mxu0 %v1619_v8  ;;  %1590 = vmatprep.subr.bf16.mxu1 %v1619_v8  ;;  %v1653_v44 = vld [vmem:[#allocation3 + $0x80] ss:$8 sps:$4 sm:$0xff]   ;;  %v1654_v45 = vld [vmem:[#allocation3 + $0x94] ss:$8 sps:$4 sm:$0xff]   ;;  %v1656_v46 = vld [vmem:[#allocation3 + $0x90] ss:$8 sps:$4 sm:$0xff]  }
  0x5b   :  { %v1660_v47 = vld [vmem:[#allocation3 + $0xa4] ss:$8 sps:$4 sm:$0xff]   ;;  %v1662_v48 = vld [vmem:[#allocation3 + $0xa0] ss:$8 sps:$4 sm:$0xff]   ;;  %v1666_v49 = vld [vmem:[#allocation3 + $0xb4] ss:$8 sps:$4 sm:$0xff]  }
  0x5c   :  { %v1678_v50 = vld [vmem:[#allocation9 + $0x18] sm:$0xff]   ;;  %v1679_v52 = vld [vmem:[#allocation9 + $0x20] sm:$0xff]   ;;  %v1680_v53 = vld [vmem:[#allocation9 + $0x28] sm:$0xff]  }
  0x5d   :  { %1411 = vmatpush3.bf16.msra.mxu0 %v1620_v9  ;;  %1598 = vmatpush3.bf16.msra.mxu1 %v1620_v9  ;;  %v1668_v51 = vld [vmem:[#allocation3 + $0xb0] ss:$8 sps:$4 sm:$0xff]   ;;  %v1896_v57 = vld [vmem:[#allocation8] ss:$0 sm:$0xff] }
  0x5e   :  { %1412 = vmatprep.subr.bf16.mxu0 %v1621_v10  ;;  %1591 = vmatprep.subr.bf16.mxu1 %v1621_v10  ;;  %v1681_v54 = vld [vmem:[#allocation9 + $0x30] sm:$0xff]   ;;  %v1682_v55 = vld [vmem:[#allocation9 + $0x38] sm:$0xff]  }
  0x61   :  { %1413 = vmatpush3.bf16.msra.mxu0 %v1622_v12  ;;  %1599 = vmatpush3.bf16.msra.mxu1 %v1622_v12 }
  0x62   :  { %1414 = vmatprep.subr.bf16.mxu0 %v1623_v13  ;;  %1592 = vmatprep.subr.bf16.mxu1 %v1623_v13 }
  0x65   :  { %1415 = vmatpush3.bf16.msra.mxu0 %v1624_v14  ;;  %1600 = vmatpush3.bf16.msra.mxu1 %v1624_v14 }
  0x66   :  { %1416 = vmatprep.subr.bf16.mxu0 %v1625_v15  ;;  %1593 = vmatprep.subr.bf16.mxu1 %v1625_v15 }
  0x69   :  { %1417 = vmatpush3.bf16.msra.mxu0 %v1626_v16  ;;  %1601 = vmatpush3.bf16.msra.mxu1 %v1626_v16 }
  0x6a   :  { %1538 = vmatprep.subr.bf16.mxu1 %v1675_v26 }
  0x6c   :  { %505 = vmatmul.mubr.bf16.vlgmr.msra.gmra.mrb[0].mxu0 %v1627_v17  ;;  %601 = vmatmul.mubr.bf16.vlgmr.msra.gmra.mrb[0].mxu1 %v1657_v20 }
  0x6d   :  { %512 = vmatprep.mubr.bf16.mxu0 %v1630_v19  ;;  %608 = vmatprep.mubr.bf16.mxu1 %v1663_v21 }
  0x6e   :  { %1539 = vmatpush3.bf16.msra.mxu1 %v1675_v26 }
  0x6f   :  { %1540 = vmatprep.subr.bf16.mxu1 %v1676_v27 }
  0x72   :  { %1541 = vmatpush3.bf16.msra.mxu1 %v1676_v27 }
  0x73   :  { %1542 = vmatprep.subr.bf16.mxu1 %v1677_v28 }
  0x74   :  { %513 = vmatmul.mubr.bf16.gmra.mrb[4].mxu0 %v1632_v22  ;;  %609 = vmatmul.mubr.bf16.gmra.mrb[4].mxu1 %v1665_v24 }
  0x75   :  { %520 = vmatprep.mubr.bf16.mxu0 %v1633_v23  ;;  %616 = vmatprep.mubr.bf16.mxu1 %v1669_v25 }
  0x76   :  { %1543 = vmatpush3.bf16.msra.mxu1 %v1677_v28 }
  0x77   :  { %1544 = vmatprep.subr.bf16.mxu1 %v1678_v50 }
  0x7a   :  { %1545 = vmatpush3.bf16.msra.mxu1 %v1678_v50 }
  0x7b   :  { %1546 = vmatprep.subr.bf16.mxu1 %v1679_v52 }
  0x7c   :  { %521 = vmatmul.mubr.bf16.gmra.mrb[8].mxu0 %v1635_v29  ;;  %617 = vmatmul.mubr.bf16.gmra.mrb[8].mxu1 %v1671_v31 }
  0x7d   :  { %528 = vmatprep.mubr.bf16.mxu0 %v1636_v30  ;;  %624 = vmatprep.mubr.bf16.mxu1 %v1672_v32 }
  0x7e   :  { %1547 = vmatpush3.bf16.msra.mxu1 %v1679_v52 }
  0x7f   :  { %1548 = vmatprep.subr.bf16.mxu1 %v1680_v53 }
  0x82   :  { %1549 = vmatpush3.bf16.msra.mxu1 %v1680_v53 }
  0x83   :  { %1550 = vmatprep.subr.bf16.mxu1 %v1681_v54 }
  0x84   :  { %529 = vmatmul.mubr.bf16.gmra.mrb[12].mxu0 %v1638_v33  ;;  %625 = vmatmul.mubr.bf16.gmra.mrb[12].mxu1 %v1674_v35 }
  0x85   :  { %536 = vmatprep.mubr.bf16.mxu0 %v1639_v34 }
  0x86   :  { %1551 = vmatpush3.bf16.msra.mxu1 %v1681_v54 }
  0x87   :  { %1552 = vmatprep.subr.bf16.mxu1 %v1682_v55 }
  0x8a   :  { %1553 = vmatpush3.bf16.msra.mxu1 %v1682_v55 }
  0x8c   :  { %537 = vmatmul.mubr.bf16.gmra.mrb[16].mxu0 %v1641_v36 }
  0x8d   :  { %544 = vmatprep.mubr.bf16.mxu0 %v1642_v37 }
  0x94   :  { %545 = vmatmul.mubr.bf16.gmra.mrb[20].mxu0 %v1644_v38 }
  0x95   :  { %552 = vmatprep.mubr.bf16.mxu0 %v1645_v39 }
  0x9c   :  { %553 = vmatmul.mubr.bf16.gmra.mrb[24].mxu0 %v1647_v40 }
  0x9d   :  { %560 = vmatprep.mubr.bf16.mxu0 %v1648_v41 }
  0xa4   :  { %561 = vmatmul.mubr.bf16.gmra.mrb[28].mxu0 %v1650_v42 }
  0xa5   :  { %568 = vmatprep.mubr.bf16.mxu0 %v1651_v43 }
  0xac   :  { %569 = vmatmul.mubr.bf16.gmra.mrb[32].mxu0 %v1653_v44 }
  0xad   :  { %576 = vmatprep.mubr.bf16.mxu0 %v1654_v45 }
  0xb4   :  { %577 = vmatmul.mubr.bf16.gmra.mrb[36].mxu0 %v1656_v46 }
  0xb5   :  { %584 = vmatprep.mubr.bf16.mxu0 %v1660_v47 }
  0xbc   :  { %585 = vmatmul.mubr.bf16.gmra.mrb[40].mxu0 %v1662_v48 }
  0xbd   :  { %592 = vmatprep.mubr.bf16.mxu0 %v1666_v49 }
  0xc4   :  { %593 = vmatmul.mubr.bf16.gmra.mrb[44].mxu0 %v1668_v51 }
 0x13f   :  { %v1418_v56 = vpop.f32.mrb[0].mxu0  ;;  %v1490_v59 = vpop.f32.mrb[0].mxu1 }
 0x140   :  { %v1419_v58 = vpop.f32.mrb[1].mxu0  ;;  %v1491_v62 = vpop.f32.mrb[1].mxu1 }
 0x141   :  { %v1420_v60 = vadd.f32 %v1419_v58, %v1418_v56  ;;  %v1421_v61 = vpop.f32.mrb[2].mxu0  ;;  %v1492_v0 = vadd.f32 %v1491_v62, %v1490_v59  ;;  %v1493_v1 = vpop.f32.mrb[2].mxu1 }
 0x142   :  { %v1422_v63 = vpop.f32.mrb[3].mxu0  ;;  %v1494_v4 = vpop.f32.mrb[3].mxu1 }
 0x143   :  { %v633_v2 = vadd.f32 %v1420_v60, %v1896_v57  ;;  %v1423_v3 = vadd.f32 %v1422_v63, %v1421_v61  ;;  %v657_v5 = vadd.f32 %v1492_v0, %v1896_v57  ;;  %v1495_v6 = vadd.f32 %v1494_v4, %v1493_v1 }
 0x145   :  { %v634_v7 = vadd.f32 %v1423_v3, %v1896_v57  ;;  %v756_v8 = vmax.f32 %v657_v5, 0.0  ;;  %v658_v9 = vadd.f32 %v1495_v6, %v1896_v57  ;;  %v732_v10 = vmax.f32 %v633_v2, 0.0 }
 0x147   :  { %v733_v11 = vmax.f32 %v634_v7, 0.0  ;;  %v1424_v12 = vpop.f32.mrb[4].mxu0  ;;  %v757_v14 = vmax.f32 %v658_v9, 0.0  ;;  %v1496_v15 = vpop.f32.mrb[4].mxu1 }
 0x148   :  { %v1425_v13 = vpop.f32.mrb[5].mxu0  ;;  %v1497_v19 = vpop.f32.mrb[5].mxu1 }
 0x149   :  { %v1426_v16 = vadd.f32 %v1425_v13, %v1424_v12  ;;  %v1427_v17 = vpop.f32.mrb[6].mxu0  ;;  %v764_v18 = vpack.c.bf16 %v733_v11, %v732_v10  ;;  %v1498_v21 = vadd.f32 %v1497_v19, %v1496_v15  ;;  %v1499_v22 = vpop.f32.mrb[6].mxu1  ;;  %v1902_v23 = vpack.c.bf16 %v757_v14, %v756_v8 }
 0x14a   :  { %v1428_v20 = vpop.f32.mrb[7].mxu0  ;;  %v1500_v26 = vpop.f32.mrb[7].mxu1 }
 0x14b   :  { %v635_v24 = vadd.f32 %v1426_v16, %v1896_v57  ;;  %v1429_v25 = vadd.f32 %v1428_v20, %v1427_v17  ;;  %1554 = vmatprep.mubr.bf16.mxu1 %v764_v18  ;;  %v659_v27 = vadd.f32 %v1498_v21, %v1896_v57  ;;  %v1501_v28 = vadd.f32 %v1500_v26, %v1499_v22 }
 0x14d   :  { %v636_v29 = vadd.f32 %v1429_v25, %v1896_v57  ;;  %v758_v30 = vmax.f32 %v659_v27, 0.0  ;;  %v660_v31 = vadd.f32 %v1501_v28, %v1896_v57  ;;  %v734_v32 = vmax.f32 %v635_v24, 0.0 }
 0x14f   :  { %v735_v33 = vmax.f32 %v636_v29, 0.0  ;;  %v1430_v34 = vpop.f32.mrb[8].mxu0  ;;  %v759_v36 = vmax.f32 %v660_v31, 0.0  ;;  %v1502_v37 = vpop.f32.mrb[8].mxu1 }
 0x150   :  { %v1431_v35 = vpop.f32.mrb[9].mxu0  ;;  %v1503_v41 = vpop.f32.mrb[9].mxu1 }
 0x151   :  { %v765_v38 = vpack.c.bf16 %v735_v33, %v734_v32  ;;  %v1432_v39 = vadd.f32 %v1431_v35, %v1430_v34  ;;  %v1433_v40 = vpop.f32.mrb[10].mxu0  ;;  %v1504_v43 = vadd.f32 %v1503_v41, %v1502_v37  ;;  %v1505_v44 = vpop.f32.mrb[10].mxu1  ;;  %v1908_v45 = vpack.c.bf16 %v759_v36, %v758_v30 }
 0x152   :  { %v1434_v42 = vpop.f32.mrb[11].mxu0  ;;  %v1506_v48 = vpop.f32.mrb[11].mxu1 }
 0x153   :  { %v637_v46 = vadd.f32 %v1432_v39, %v1896_v57  ;;  %v1435_v47 = vadd.f32 %v1434_v42, %v1433_v40  ;;  %1555 = vmatmul.mubr.bf16.vlgmr.msra.gmra.mrb[16].mxu1 %v765_v38  ;;  %v661_v49 = vadd.f32 %v1504_v43, %v1896_v57  ;;  %v1507_v50 = vadd.f32 %v1506_v48, %v1505_v44 }
 0x155   :  { %v638_v51 = vadd.f32 %v1435_v47, %v1896_v57  ;;  %v760_v52 = vmax.f32 %v661_v49, 0.0  ;;  %v662_v53 = vadd.f32 %v1507_v50, %v1896_v57  ;;  %v736_v54 = vmax.f32 %v637_v46, 0.0 }
 0x157   :  { %v737_v55 = vmax.f32 %v638_v51, 0.0  ;;  %v1436_v56 = vpop.f32.mrb[12].mxu0  ;;  %v761_v59 = vmax.f32 %v662_v53, 0.0  ;;  %v1508_v60 = vpop.f32.mrb[12].mxu1 }
 0x158   :  { %v1437_v58 = vpop.f32.mrb[13].mxu0  ;;  %v1509_v0 = vpop.f32.mrb[13].mxu1 }
 0x159   :  { %v1438_v61 = vadd.f32 %v1437_v58, %v1436_v56  ;;  %v1439_v62 = vpop.f32.mrb[14].mxu0  ;;  %v766_v63 = vpack.c.bf16 %v737_v55, %v736_v54  ;;  %v1510_v2 = vadd.f32 %v1509_v0, %v1508_v60  ;;  %v1511_v3 = vpop.f32.mrb[14].mxu1  ;;  %v1914_v4 = vpack.c.bf16 %v761_v59, %v760_v52 }
 0x15a   :  { %v1440_v1 = vpop.f32.mrb[15].mxu0  ;;  %v1512_v7 = vpop.f32.mrb[15].mxu1 }
 0x15b   :  { %v639_v5 = vadd.f32 %v1438_v61, %v1896_v57  ;;  %v1441_v6 = vadd.f32 %v1440_v1, %v1439_v62  ;;  %1558 = vmatprep.mubr.bf16.mxu1 %v766_v63  ;;  %v663_v8 = vadd.f32 %v1510_v2, %v1896_v57  ;;  %v1513_v9 = vadd.f32 %v1512_v7, %v1511_v3 }
 0x15d   :  { %v640_v10 = vadd.f32 %v1441_v6, %v1896_v57  ;;  %v762_v11 = vmax.f32 %v663_v8, 0.0  ;;  %v664_v12 = vadd.f32 %v1513_v9, %v1896_v57  ;;  %v738_v13 = vmax.f32 %v639_v5, 0.0 }
 0x15f   :  { %v739_v14 = vmax.f32 %v640_v10, 0.0  ;;  %v1442_v15 = vpop.f32.mrb[16].mxu0  ;;  %v763_v17 = vmax.f32 %v664_v12, 0.0 }
 0x160   :  { %v1443_v16 = vpop.f32.mrb[17].mxu0 }
 0x161   :  { %v1444_v18 = vadd.f32 %v1443_v16, %v1442_v15  ;;  %v1445_v19 = vpop.f32.mrb[18].mxu0  ;;  %v767_v20 = vpack.c.bf16 %v739_v14, %v738_v13  ;;  %v1920_v22 = vpack.c.bf16 %v763_v17, %v762_v11 }
 0x162   :  { %v1446_v21 = vpop.f32.mrb[19].mxu0 }
 0x163   :  { %v641_v24 = vadd.f32 %v1444_v18, %v1896_v57  ;;  %v1447_v25 = vadd.f32 %v1446_v21, %v1445_v19  ;;  %1559 = vmatmul.mubr.bf16.gmra.mrb[20].mxu1 %v767_v20 }
 0x165   :  { %v642_v26 = vadd.f32 %v1447_v25, %v1896_v57  ;;  %v740_v27 = vmax.f32 %v641_v24, 0.0 }
 0x167   :  { %v741_v28 = vmax.f32 %v642_v26, 0.0  ;;  %v1448_v29 = vpop.f32.mrb[20].mxu0 }
 0x168   :  { %v1449_v30 = vpop.f32.mrb[21].mxu0 }
 0x169   :  { %v1450_v31 = vadd.f32 %v1449_v30, %v1448_v29  ;;  %v1451_v32 = vpop.f32.mrb[22].mxu0  ;;  %v768_v33 = vpack.c.bf16 %v741_v28, %v740_v27 }
 0x16a   :  { %v1452_v34 = vpop.f32.mrb[23].mxu0 }
 0x16b   :  { %v643_v35 = vadd.f32 %v1450_v31, %v1896_v57  ;;  %v1453_v36 = vadd.f32 %v1452_v34, %v1451_v32  ;;  %1562 = vmatprep.mubr.bf16.mxu1 %v768_v33 }
 0x16d   :  { %v644_v37 = vadd.f32 %v1453_v36, %v1896_v57  ;;  %v742_v38 = vmax.f32 %v643_v35, 0.0 }
 0x16f   :  { %v743_v39 = vmax.f32 %v644_v37, 0.0  ;;  %v1454_v40 = vpop.f32.mrb[24].mxu0 }
 0x170   :  { %v1455_v41 = vpop.f32.mrb[25].mxu0 }
 0x171   :  { %v1456_v42 = vadd.f32 %v1455_v41, %v1454_v40  ;;  %v1457_v43 = vpop.f32.mrb[26].mxu0  ;;  %v769_v44 = vpack.c.bf16 %v743_v39, %v742_v38 }
 0x172   :  { %v1458_v46 = vpop.f32.mrb[27].mxu0 }
 0x173   :  { %v645_v47 = vadd.f32 %v1456_v42, %v1896_v57  ;;  %v1459_v48 = vadd.f32 %v1458_v46, %v1457_v43  ;;  %1563 = vmatmul.mubr.bf16.gmra.mrb[24].mxu1 %v769_v44 }
 0x175   :  { %v646_v49 = vadd.f32 %v1459_v48, %v1896_v57  ;;  %v744_v50 = vmax.f32 %v645_v47, 0.0 }
 0x177   :  { %v745_v51 = vmax.f32 %v646_v49, 0.0  ;;  %v1460_v52 = vpop.f32.mrb[28].mxu0 }
 0x178   :  { %v1461_v53 = vpop.f32.mrb[29].mxu0 }
 0x179   :  { %v1462_v54 = vadd.f32 %v1461_v53, %v1460_v52  ;;  %v1463_v55 = vpop.f32.mrb[30].mxu0  ;;  %v770_v56 = vpack.c.bf16 %v745_v51, %v744_v50 }
 0x17a   :  { %v1464_v58 = vpop.f32.mrb[31].mxu0 }
 0x17b   :  { %v647_v59 = vadd.f32 %v1462_v54, %v1896_v57  ;;  %v1465_v60 = vadd.f32 %v1464_v58, %v1463_v55  ;;  %1566 = vmatprep.mubr.bf16.mxu1 %v770_v56 }
 0x17d   :  { %v648_v61 = vadd.f32 %v1465_v60, %v1896_v57  ;;  %v746_v62 = vmax.f32 %v647_v59, 0.0 }
 0x17f   :  { %v747_v63 = vmax.f32 %v648_v61, 0.0  ;;  %v1466_v0 = vpop.f32.mrb[32].mxu0 }
 0x180   :  { %v1467_v1 = vpop.f32.mrb[33].mxu0 }
 0x181   :  { %v1468_v2 = vadd.f32 %v1467_v1, %v1466_v0  ;;  %v1469_v3 = vpop.f32.mrb[34].mxu0  ;;  %v771_v5 = vpack.c.bf16 %v747_v63, %v746_v62 }
 0x182   :  { %v1470_v6 = vpop.f32.mrb[35].mxu0 }
 0x183   :  { %v649_v7 = vadd.f32 %v1468_v2, %v1896_v57  ;;  %v1471_v8 = vadd.f32 %v1470_v6, %v1469_v3  ;;  %1567 = vmatmul.mubr.bf16.gmra.mrb[28].mxu1 %v771_v5 }
 0x185   :  { %v650_v9 = vadd.f32 %v1471_v8, %v1896_v57  ;;  %v748_v10 = vmax.f32 %v649_v7, 0.0 }
 0x187   :  { %v749_v11 = vmax.f32 %v650_v9, 0.0  ;;  %v1472_v12 = vpop.f32.mrb[36].mxu0 }
 0x188   :  { %v1473_v13 = vpop.f32.mrb[37].mxu0 }
 0x189   :  { %v1474_v14 = vadd.f32 %v1473_v13, %v1472_v12  ;;  %v1475_v15 = vpop.f32.mrb[38].mxu0  ;;  %v772_v16 = vpack.c.bf16 %v749_v11, %v748_v10 }
 0x18a   :  { %v1476_v17 = vpop.f32.mrb[39].mxu0 }
 0x18b   :  { %v651_v18 = vadd.f32 %v1474_v14, %v1896_v57  ;;  %v1477_v19 = vadd.f32 %v1476_v17, %v1475_v15  ;;  %1570 = vmatprep.mubr.bf16.mxu1 %v772_v16 }
 0x18d   :  { %v652_v20 = vadd.f32 %v1477_v19, %v1896_v57  ;;  %v750_v21 = vmax.f32 %v651_v18, 0.0 }
 0x18f   :  { %v751_v24 = vmax.f32 %v652_v20, 0.0  ;;  %v1478_v25 = vpop.f32.mrb[40].mxu0 }
 0x190   :  { %v1479_v26 = vpop.f32.mrb[41].mxu0 }
 0x191   :  { %v1480_v27 = vadd.f32 %v1479_v26, %v1478_v25  ;;  %v1481_v28 = vpop.f32.mrb[42].mxu0  ;;  %v773_v29 = vpack.c.bf16 %v751_v24, %v750_v21 }
 0x192   :  { %v1482_v30 = vpop.f32.mrb[43].mxu0 }
 0x193   :  { %v653_v31 = vadd.f32 %v1480_v27, %v1896_v57  ;;  %v1483_v32 = vadd.f32 %v1482_v30, %v1481_v28  ;;  %1571 = vmatmul.mubr.bf16.gmra.mrb[32].mxu1 %v773_v29 }
 0x195   :  { %v654_v33 = vadd.f32 %v1483_v32, %v1896_v57  ;;  %v752_v34 = vmax.f32 %v653_v31, 0.0 }
 0x197   :  { %v753_v35 = vmax.f32 %v654_v33, 0.0  ;;  %v1484_v36 = vpop.f32.mrb[44].mxu0 }
 0x198   :  { %v1485_v37 = vpop.f32.mrb[45].mxu0 }
 0x199   :  { %v1486_v38 = vadd.f32 %v1485_v37, %v1484_v36  ;;  %v1487_v39 = vpop.f32.mrb[46].mxu0  ;;  %v774_v40 = vpack.c.bf16 %v753_v35, %v752_v34 }
 0x19a   :  { %v1488_v41 = vpop.f32.mrb[47].mxu0 }
 0x19b   :  { %v655_v42 = vadd.f32 %v1486_v38, %v1896_v57  ;;  %v1489_v43 = vadd.f32 %v1488_v41, %v1487_v39  ;;  %1574 = vmatprep.mubr.bf16.mxu1 %v774_v40 }
 0x19d   :  { %v656_v44 = vadd.f32 %v1489_v43, %v1896_v57  ;;  %v754_v46 = vmax.f32 %v655_v42, 0.0 }
 0x19f   :  { %v755_v47 = vmax.f32 %v656_v44, 0.0 }
 0x1a1   :  { %v775_v48 = vpack.c.bf16 %v755_v47, %v754_v46 }
 0x1a3   :  { %1575 = vmatmul.mubr.bf16.gmra.mrb[36].mxu1 %v775_v48 }
 0x1a4   :  { %1578 = vmatprep.mubr.bf16.mxu1 %v1902_v23 }
 0x1ab   :  { %1579 = vmatmul.mubr.bf16.gmra.mrb[40].mxu1 %v1908_v45 }
 0x1ac   :  { %1582 = vmatprep.mubr.bf16.mxu1 %v1914_v4 }
 0x1b3   :  { %1583 = vmatmul.mubr.bf16.gmra.mrb[44].mxu1 %v1920_v22 }
 0x226   :  { %v1556_v49 = vpop.f32.mrb[16].mxu1 }
 0x227   :  { %v878_v50 = vpop.f32.mrb[17].mxu1 }
 0x228   :  { %v1557_v51 = vpop.f32.mrb[18].mxu1 }
 0x229   :  { %v1315_v52 = vpack.c.bf16 %v1557_v51, %v1556_v49  ;;  %v881_v53 = vpop.f32.mrb[19].mxu1 }
 0x22a   :  { %v1310_v54 = vpack.c.bf16 %v881_v53, %v878_v50 }
 0x22b   :  { %1387 = vst [vmem:[#allocation11 + $0x8] sm:$0xff] %v1315_v52  }
 0x22c   :  { %1311 = vst [vmem:[#allocation11] sm:$0xff] %v1310_v54  }
 0x236   :  { %v1560_v57 = vpop.f32.mrb[20].mxu1 }
 0x237   :  { %v894_v55 = vpop.f32.mrb[21].mxu1 }
 0x238   :  { %v1561_v56 = vpop.f32.mrb[22].mxu1 }
 0x239   :  { %v1325_v58 = vpack.c.bf16 %v1561_v56, %v1560_v57  ;;  %v897_v59 = vpop.f32.mrb[23].mxu1 }
 0x23a   :  { %v1320_v23 = vpack.c.bf16 %v897_v59, %v894_v55 }
 0x23b   :  { %1389 = vst [vmem:[#allocation11 + $0x18] sm:$0xff] %v1325_v58  }
 0x23c   :  { %1388 = vst [vmem:[#allocation11 + $0x10] sm:$0xff] %v1320_v23  }
 0x246   :  { %v1564_v45 = vpop.f32.mrb[24].mxu1 }
 0x247   :  { %v910_v4 = vpop.f32.mrb[25].mxu1 }
 0x248   :  { %v1565_v60 = vpop.f32.mrb[26].mxu1 }
 0x249   :  { %v1335_v22 = vpack.c.bf16 %v1565_v60, %v1564_v45  ;;  %v913_v61 = vpop.f32.mrb[27].mxu1 }
 0x24a   :  { %v1330_v62 = vpack.c.bf16 %v913_v61, %v910_v4 }
 0x24b   :  { %1391 = vst [vmem:[#allocation11 + $0x28] sm:$0xff] %v1335_v22  }
 0x24c   :  { %1390 = vst [vmem:[#allocation11 + $0x20] sm:$0xff] %v1330_v62  }
 0x256   :  { %v1568_v63 = vpop.f32.mrb[28].mxu1 }
 0x257   :  { %v926_v0 = vpop.f32.mrb[29].mxu1 }
 0x258   :  { %v1569_v1 = vpop.f32.mrb[30].mxu1 }
 0x259   :  { %v1345_v2 = vpack.c.bf16 %v1569_v1, %v1568_v63  ;;  %v929_v3 = vpop.f32.mrb[31].mxu1 }
 0x25a   :  { %v1340_v5 = vpack.c.bf16 %v929_v3, %v926_v0 }
 0x25b   :  { %1393 = vst [vmem:[#allocation11 + $0x38] sm:$0xff] %v1345_v2  }
 0x25c   :  { %1392 = vst [vmem:[#allocation11 + $0x30] sm:$0xff] %v1340_v5  }
 0x266   :  { %v1572_v6 = vpop.f32.mrb[32].mxu1 }
 0x267   :  { %v942_v7 = vpop.f32.mrb[33].mxu1 }
 0x268   :  { %v1573_v8 = vpop.f32.mrb[34].mxu1 }
 0x269   :  { %v1355_v9 = vpack.c.bf16 %v1573_v8, %v1572_v6  ;;  %v945_v10 = vpop.f32.mrb[35].mxu1 }
 0x26a   :  { %v1350_v11 = vpack.c.bf16 %v945_v10, %v942_v7 }
 0x26b   :  { %1395 = vst [vmem:[#allocation11 + $0x48] sm:$0xff] %v1355_v9  }
 0x26c   :  { %1394 = vst [vmem:[#allocation11 + $0x40] sm:$0xff] %v1350_v11  }
 0x276   :  { %v1576_v12 = vpop.f32.mrb[36].mxu1 }
 0x277   :  { %v958_v13 = vpop.f32.mrb[37].mxu1 }
 0x278   :  { %v1577_v14 = vpop.f32.mrb[38].mxu1 }
 0x279   :  { %v1365_v15 = vpack.c.bf16 %v1577_v14, %v1576_v12  ;;  %v961_v16 = vpop.f32.mrb[39].mxu1 }
 0x27a   :  { %v1360_v17 = vpack.c.bf16 %v961_v16, %v958_v13 }
 0x27b   :  { %1397 = vst [vmem:[#allocation11 + $0x58] sm:$0xff] %v1365_v15  }
 0x27c   :  { %1396 = vst [vmem:[#allocation11 + $0x50] sm:$0xff] %v1360_v17  }
 0x27e   :  { %v1580_v18 = vpop.f32.mrb[40].mxu1 }
 0x27f   :  { %v974_v19 = vpop.f32.mrb[41].mxu1 }
 0x280   :  { %v1581_v20 = vpop.f32.mrb[42].mxu1 }
 0x281   :  { %v1375_v21 = vpack.c.bf16 %v1581_v20, %v1580_v18  ;;  %v977_v24 = vpop.f32.mrb[43].mxu1 }
 0x282   :  { %v1370_v25 = vpack.c.bf16 %v977_v24, %v974_v19 }
 0x283   :  { %1399 = vst [vmem:[#allocation11 + $0x68] sm:$0xff] %v1375_v21  }
 0x284   :  { %1398 = vst [vmem:[#allocation11 + $0x60] sm:$0xff] %v1370_v25  }
 0x286   :  { %v1584_v26 = vpop.f32.mrb[44].mxu1 }
 0x287   :  { %v990_v27 = vpop.f32.mrb[45].mxu1 }
 0x288   :  { %v1585_v28 = vpop.f32.mrb[46].mxu1 }
 0x289   :  { %v1385_v29 = vpack.c.bf16 %v1585_v28, %v1584_v26  ;;  %v993_v30 = vpop.f32.mrb[47].mxu1 }
 0x28a   :  { %v1380_v31 = vpack.c.bf16 %v993_v30, %v990_v27 }
 0x28b   :  { %1401 = vst [vmem:[#allocation11 + $0x78] sm:$0xff] %v1385_v29  }
 0x28c   :  { %1400 = vst [vmem:[#allocation11 + $0x70] sm:$0xff] %v1380_v31  }
 0x28d   :  { %1782 = shalt.err (!%p1779_p8)
}
 0x28e   :  { %s1783_s18 = scalar_lea.hbm %s1961_s4, 2048 }
 0x28f   :  { %p1784_p9 = scmp.ne.s32.totalorder %s1961_s4, %s1783_s18  ;;  %p1787_p10 = scmp.lt.u32.totalorder %s1783_s18, %s1961_s4 }
 0x291   :  { %p1789_p11 = pnand %p1787_p10, %p1784_p9 }
 0x293   :  { %1792 = shalt.err (!%p1789_p11)
}
 0x294   :  { %1176 = dma.vmem_to_hbm [thread:$0]  %s1171_s14, 2048, %s1961_s4, [#allocation5], %s1802_s25, %s1802_s25, %s1803_s26  }
 0x295   :  { %1799 = dma.done.wait [#allocation5], 2048  }
 0x296   :  { %1800 = vsyncadd [#allocation5], 4294965248 }
 0x297   :  { %1180 = vsyncpa [#allocation4], 1 }
 0x298   :  { %1181 = vsyncpa [#allocation7], 1 }
 0x299   :  { %1182 = vsyncpa [#allocation10], 1 }
 0x29a   :  { %1183 = vsyncpa [#allocation5], 1 }

</bundles_post_ra>
